<compile_context>
chip_gen: v7x
topology: tpu7x:2x2x1
jax: 0.10.0
libtpu: 0.0.40
codegen_flags: <defaults>
</compile_context>

<pallas_src>
import functools
import math

import jax
import jax.numpy as jnp
from jax.experimental import pallas as pl
from jax.experimental.pallas import tpu as pltpu

D_MODEL = 32
N_HEADS = 4
NUM_LAYERS = 2
DIM_FF = 2048          # PyTorch default dim_feedforward
LN_EPS = 1e-5
SEQ = 8
BATCH = 2


def _layer_norm(x, g, b, eps):
    mu = jnp.mean(x, axis=-1, keepdims=True)
    var = jnp.mean((x - mu) ** 2, axis=-1, keepdims=True)
    return (x - mu) * jax.lax.rsqrt(var + eps) * g + b


def _fused_transformer_kernel(
        x_ref,                      # (S*B, D) tokens, time-major (resident)
        w_in_ref,                   # (L, 3, H, D, hd)  q/k/v per-head weights (resident)
        b_in_ref,                   # (L, 3, H, 1, hd)  q/k/v per-head biases  (resident)
        wo_ref,                     # (L, H, hd, D)     out-proj per-head      (resident)
        vd_ref,                     # (L, 6, D) = [bo, g1, be1, b2, g2, be2]   (resident)
        b1_ref,                     # (L, 1, FF)                               (resident)
        fc_ref,                     # (D+1, 1) = [fc_w ; fc_b]                 (resident)
        w1_ref,                     # (D, FF) bf16, streamed per layer
        w2_ref,                     # (D, FF) bf16, streamed per layer (lane-dense, trans_b)
        o_ref,                      # (B, 1) output, written on the last layer only
        act_ref,                    # (S*B, D) f32 VMEM scratch, resident across layers
        *, n_heads, seq, batch, eps):
    layer = pl.program_id(0)
    n_tok = batch * seq

    @pl.when(layer == 0)
    def _():
        act_ref[...] = x_ref[...]

    x = act_ref[...]                        # (S*B, D), token i = (s=i//B, b=i%B)
    d = x.shape[-1]
    hd = d // n_heads
    scale = 1.0 / math.sqrt(hd)

    vd = vd_ref[layer]                      # (6, D)
    bo, g1, be1 = vd[0:1, :], vd[1:2, :], vd[2:3, :]
    b2, g2, be2 = vd[3:4, :], vd[4:5, :], vd[5:6, :]

    # Block-diagonal (same-batch) attention mask over all S*B tokens.  Tokens are
    # time-major, so batch(i) = i % B.  BATCH is a power of two -> bit ops on the VPU.
    ii = jax.lax.broadcasted_iota(jnp.int32, (n_tok, n_tok), 0)
    jj = jax.lax.broadcasted_iota(jnp.int32, (n_tok, n_tok), 1)
    if batch & (batch - 1) == 0:
        same_batch = (ii & (batch - 1)) == (jj & (batch - 1))
    else:
        same_batch = (ii % batch) == (jj % batch)

    # ---- multi-head self attention: plain 2-D matmuls only (no lane slices) ----
    attn = jnp.zeros((n_tok, d), jnp.float32)
    for h in range(n_heads):
        qh = jnp.dot(x, w_in_ref[layer, 0, h],
                     preferred_element_type=jnp.float32) + b_in_ref[layer, 0, h]
        kh = jnp.dot(x, w_in_ref[layer, 1, h],
                     preferred_element_type=jnp.float32) + b_in_ref[layer, 1, h]
        vh = jnp.dot(x, w_in_ref[layer, 2, h],
                     preferred_element_type=jnp.float32) + b_in_ref[layer, 2, h]
        sc = jax.lax.dot_general(qh, kh, (((1,), (1,)), ((), ())),
                                 preferred_element_type=jnp.float32) * scale
        sc = jnp.where(same_batch, sc, jnp.float32(-1e30))
        sc = sc - jnp.max(sc, axis=-1, keepdims=True)
        p = jnp.exp(sc)
        p = p * pl.reciprocal(jnp.sum(p, axis=-1, keepdims=True), approx=True)
        ctx = jnp.dot(p, vh, preferred_element_type=jnp.float32)      # (n_tok, hd)
        attn = attn + jnp.dot(ctx, wo_ref[layer, h],
                              preferred_element_type=jnp.float32)
    attn = attn + bo

    # ---- residual + LayerNorm1 (PyTorch post-norm) ----
    x1 = _layer_norm(x + attn, g1, be1, eps)

    # ---- FFN: Linear -> ReLU -> Linear.  bf16 weights, f32 accumulation.
    # w2 is stored lane-dense as (D, FF); contract the FF axis of both operands.
    h1 = jnp.dot(x1.astype(jnp.bfloat16), w1_ref[...],
                 preferred_element_type=jnp.float32) + b1_ref[layer]
    h1 = jnp.maximum(h1, 0.0)
    h2 = jax.lax.dot_general(h1.astype(jnp.bfloat16), w2_ref[...],
                             (((1,), (1,)), ((), ())),
                             preferred_element_type=jnp.float32) + b2

    # ---- residual + LayerNorm2 ----
    x2 = _layer_norm(x1 + h2, g2, be2, eps)
    act_ref[...] = x2

    # ---- fused fc head on the last time step (final layer only).  Time-major order
    # means x[-1] of the (S, B, D) input is simply the last B rows. ----
    @pl.when(layer == pl.num_programs(0) - 1)
    def _():
        x_last = x2[n_tok - batch:, :]                    # (B, D)
        fcp = fc_ref[...]                                 # (D+1, 1)
        o_ref[...] = jnp.dot(x_last, fcp[:d, :],
                             preferred_element_type=jnp.float32) + fcp[d:, :]


def _resident(shape):
    # Full array, constant block index -> DMA'd once, VMEM-resident across all layers.
    n = len(shape)
    return pl.BlockSpec(shape, lambda l, _n=n: (0,) * _n)


def _streamed(shape):
    # Per-layer weight: leading layer dim squeezed, block selected by the grid step
    # (auto double-buffered -> next layer's weights prefetch behind current compute).
    n = len(shape)
    return pl.BlockSpec((None,) + shape, lambda l, _n=n: (l,) + (0,) * _n)


@jax.jit
def transformer_forward(x_sbd, params):
    # Keep the module's time-major (S, B, D) order: flattening to (S*B, D) is a free
    # reshape (no transpose, no extra XLA op / HBM round-trip).
    x_tok = x_sbd.reshape(SEQ * BATCH, D_MODEL)
    p = params
    L, D, H, HD, FF = NUM_LAYERS, D_MODEL, N_HEADS, D_MODEL // N_HEADS, DIM_FF

    in_specs = [
        _resident((SEQ * BATCH, D)),       # x
        _resident((L, 3, H, D, HD)),       # w_in
        _resident((L, 3, H, 1, HD)),       # b_in
        _resident((L, H, HD, D)),          # wo
        _resident((L, 6, D)),              # vec_d  [bo, g1, be1, b2, g2, be2]
        _resident((L, 1, FF)),             # b1
        _resident((D + 1, 1)),             # fc = [fc_w ; fc_b]
        _streamed((D, FF)),                # w1 (bf16)
        _streamed((D, FF)),                # w2 (bf16, lane-dense / trans_b)
    ]
    out_specs = _resident((BATCH, 1))

    kernel = functools.partial(_fused_transformer_kernel, n_heads=N_HEADS,
                               seq=SEQ, batch=BATCH, eps=LN_EPS)
    return pl.pallas_call(
        kernel,
        out_shape=jax.ShapeDtypeStruct((BATCH, 1), jnp.float32),
        grid_spec=pltpu.PrefetchScalarGridSpec(
            num_scalar_prefetch=0,
            grid=(NUM_LAYERS,),
            in_specs=in_specs,
            out_specs=out_specs,
            scratch_shapes=[pltpu.VMEM((SEQ * BATCH, D_MODEL), jnp.float32)]),
        compiler_params=pltpu.CompilerParams(
            dimension_semantics=("arbitrary",)),
    )(x_tok, p['w_in'], p['b_in'], p['wo'], p['vec_d'], p['b1'], p['fc'],
      p['w1'], p['w2'])


def init_params(key):
    s = 0.05
    L, D, H, HD, FF = NUM_LAYERS, D_MODEL, N_HEADS, D_MODEL // N_HEADS, DIM_FF

    def rnd(k, shape):
        return jax.random.normal(k, shape, jnp.float32) * s

    ks = jax.random.split(key, 9)
    vec_d = jnp.stack([
        rnd(ks[0], (L, D)),              # bo  (attention out-proj bias)
        jnp.ones((L, D), jnp.float32),   # g1
        jnp.zeros((L, D), jnp.float32),  # be1
        rnd(ks[1], (L, D)),              # b2  (second FFN bias)
        jnp.ones((L, D), jnp.float32),   # g2
        jnp.zeros((L, D), jnp.float32),  # be2
    ], axis=1)                           # (L, 6, D)
    return dict(
        w_in=rnd(ks[2], (L, 3, H, D, HD)),
        b_in=rnd(ks[3], (L, 3, H, 1, HD)),
        wo=rnd(ks[4], (L, H, HD, D)),
        vec_d=vec_d,
        b1=rnd(ks[5], (L, 1, FF)),
        w1=rnd(ks[6], (L, D, FF)).astype(jnp.bfloat16),
        w2=rnd(ks[7], (L, D, FF)).astype(jnp.bfloat16),   # lane-dense (D, FF): applied transposed
        fc=rnd(ks[8], (D + 1, 1)),
    )


def _ln(x, g, b):
    mu = jnp.mean(x, axis=-1, keepdims=True)
    var = jnp.mean((x - mu) ** 2, axis=-1, keepdims=True)
    return (x - mu) * jax.lax.rsqrt(var + LN_EPS) * g + b


def reference_forward(x_sbd, p):
    # Pure-JAX mirror of the PyTorch eval-mode forward (post-norm encoder + fc head).
    x = jnp.transpose(x_sbd, (1, 0, 2)).astype(jnp.float32)   # (B, S, D)
    D = x.shape[-1]
    hd = D // N_HEADS
    scale = 1.0 / math.sqrt(hd)
    for l in range(NUM_LAYERS):
        vd = p['vec_d'][l]
        bo, g1, be1, b2, g2, be2 = (vd[i] for i in range(6))
        attn = jnp.zeros_like(x)
        for h in range(N_HEADS):
            q = x @ p['w_in'][l, 0, h] + p['b_in'][l, 0, h]
            k = x @ p['w_in'][l, 1, h] + p['b_in'][l, 1, h]
            v = x @ p['w_in'][l, 2, h] + p['b_in'][l, 2, h]
            sc = jnp.einsum('bse,bte->bst', q, k) * scale
            a = jax.nn.softmax(sc, axis=-1)
            ctx = jnp.einsum('bst,bte->bse', a, v)
            attn = attn + ctx @ p['wo'][l, h]
        attn = attn + bo
        x1 = _ln(x + attn, g1, be1)
        hmid = jax.nn.relu(x1 @ p['w1'][l].astype(jnp.float32) + p['b1'][l])
        h2 = hmid @ p['w2'][l].astype(jnp.float32).T + b2
        x = _ln(x1 + h2, g2, be2)
    x_last = x[:, -1, :]
    return x_last @ p['fc'][:D, :] + p['fc'][D:, :]


if __name__ == "__main__":
    key = jax.random.PRNGKey(0)
    key, pk, xk = jax.random.split(key, 3)
    params = init_params(pk)
    x = jax.random.normal(xk, (SEQ, BATCH, D_MODEL), jnp.float32)

    out = jax.block_until_ready(transformer_forward(x, params))
    assert out.shape == (BATCH, 1), out.shape

    ref = reference_forward(x, params)
    if not bool(jnp.allclose(out, ref, atol=2e-2, rtol=2e-2)):
        raise AssertionError(f"mismatch: pallas={out} ref={ref}")

    print("KERNEL_OK")
</pallas_src>

<mosaic_0001>
module attributes {stable_mosaic.version = 11 : i64} {
  func.func @_fused_transformer_kernel(%arg0: i32, %arg1: memref<16x32xf32, #tpu.memory_space<vmem>>, %arg2: memref<2x3x4x32x8xf32, #tpu.memory_space<vmem>>, %arg3: memref<2x3x4x1x8xf32, #tpu.memory_space<vmem>>, %arg4: memref<2x4x8x32xf32, #tpu.memory_space<vmem>>, %arg5: memref<2x6x32xf32, #tpu.memory_space<vmem>>, %arg6: memref<2x1x2048xf32, #tpu.memory_space<vmem>>, %arg7: memref<33x1xf32, #tpu.memory_space<vmem>>, %arg8: memref<1x32x2048xbf16, #tpu.memory_space<vmem>>, %arg9: memref<1x32x2048xbf16, #tpu.memory_space<vmem>>, %arg10: memref<2x1xf32, #tpu.memory_space<vmem>>, %arg11: memref<16x32xf32, #tpu.memory_space<vmem>>) attributes {dimension_semantics = [#tpu.dimension_semantics<arbitrary>], iteration_bounds = array<i64: 2>, scalar_prefetch = 0 : i64, scratch_operands = 1 : i64, tpu.core_type = #tpu.core_type<tc>, window_params = [{pipeline_mode = #tpu.pipeline_mode<synchronous>, transform_indices = @transform_0, window_bounds = array<i64: 16, 32>}, {pipeline_mode = #tpu.pipeline_mode<synchronous>, transform_indices = @transform_1, window_bounds = array<i64: 2, 3, 4, 32, 8>}, {pipeline_mode = #tpu.pipeline_mode<synchronous>, transform_indices = @transform_2, window_bounds = array<i64: 2, 3, 4, 1, 8>}, {pipeline_mode = #tpu.pipeline_mode<synchronous>, transform_indices = @transform_3, window_bounds = array<i64: 2, 4, 8, 32>}, {pipeline_mode = #tpu.pipeline_mode<synchronous>, transform_indices = @transform_4, window_bounds = array<i64: 2, 6, 32>}, {pipeline_mode = #tpu.pipeline_mode<synchronous>, transform_indices = @transform_5, window_bounds = array<i64: 2, 1, 2048>}, {pipeline_mode = #tpu.pipeline_mode<synchronous>, transform_indices = @transform_6, window_bounds = array<i64: 33, 1>}, {transform_indices = @transform_7, window_bounds = array<i64: 1, 32, 2048>}, {transform_indices = @transform_8, window_bounds = array<i64: 1, 32, 2048>}, {pipeline_mode = #tpu.pipeline_mode<synchronous>, transform_indices = @transform_9, window_bounds = array<i64: 2, 1>}]} {
    %c0_i32 = arith.constant 0 : i32
    %0 = arith.cmpi eq, %arg0, %c0_i32 : i32
    %1 = arith.extui %0 : i1 to i32
    %c0_i32_0 = arith.constant 0 : i32
    %2 = arith.cmpi ne, %1, %c0_i32_0 : i32
    scf.if %2 {
      %c0_175 = arith.constant 0 : index
      %c0_176 = arith.constant 0 : index
      %282 = vector.load %arg1[%c0_175, %c0_176] : memref<16x32xf32, #tpu.memory_space<vmem>>, vector<16x32xf32>
      %c0_177 = arith.constant 0 : index
      %c0_178 = arith.constant 0 : index
      %283 = vector.load %arg11[%c0_177, %c0_178] : memref<16x32xf32, #tpu.memory_space<vmem>>, vector<16x32xf32>
      tpu.vector_store %arg11[%c0_177, %c0_178], %282 {strides = array<i32>} : memref<16x32xf32, #tpu.memory_space<vmem>>, vector<16x32xf32>,
    } else {
    }
    %c0 = arith.constant 0 : index
    %c0_1 = arith.constant 0 : index
    %3 = vector.load %arg11[%c0, %c0_1] : memref<16x32xf32, #tpu.memory_space<vmem>>, vector<16x32xf32>
    %4 = arith.index_cast %arg0 : i32 to index
    %c0_2 = arith.constant 0 : index
    %c0_3 = arith.constant 0 : index
    %5 = vector.load %arg5[%4, %c0_2, %c0_3] : memref<2x6x32xf32, #tpu.memory_space<vmem>>, vector<1x6x32xf32>
    %6 = vector.shape_cast %5 : vector<1x6x32xf32> to vector<6x32xf32>
    %7 = vector.extract_strided_slice %6 {offsets = [0, 0], sizes = [1, 32], strides = [1, 1]} : vector<6x32xf32> to vector<1x32xf32>
    %8 = vector.extract_strided_slice %6 {offsets = [1, 0], sizes = [1, 32], strides = [1, 1]} : vector<6x32xf32> to vector<1x32xf32>
    %9 = vector.extract_strided_slice %6 {offsets = [2, 0], sizes = [1, 32], strides = [1, 1]} : vector<6x32xf32> to vector<1x32xf32>
    %10 = vector.extract_strided_slice %6 {offsets = [3, 0], sizes = [1, 32], strides = [1, 1]} : vector<6x32xf32> to vector<1x32xf32>
    %11 = vector.extract_strided_slice %6 {offsets = [4, 0], sizes = [1, 32], strides = [1, 1]} : vector<6x32xf32> to vector<1x32xf32>
    %12 = vector.extract_strided_slice %6 {offsets = [5, 0], sizes = [1, 32], strides = [1, 1]} : vector<6x32xf32> to vector<1x32xf32>
    %13 = tpu.iota {dimensions = array<i32: 0>} : vector<16x16xi32>
    %14 = tpu.iota {dimensions = array<i32: 1>} : vector<16x16xi32>
    %c1_i32 = arith.constant 1 : i32
    %15 = vector.broadcast %c1_i32 : i32 to vector<16x16xi32>
    %16 = arith.andi %13, %15 : vector<16x16xi32>
    %c1_i32_4 = arith.constant 1 : i32
    %17 = vector.broadcast %c1_i32_4 : i32 to vector<16x16xi32>
    %18 = arith.andi %14, %17 : vector<16x16xi32>
    %19 = arith.cmpi eq, %16, %18 : vector<16x16xi32>
    %cst = arith.constant 0.000000e+00 : f32
    %20 = vector.broadcast %cst : f32 to vector<16x32xf32>
    %21 = arith.index_cast %arg0 : i32 to index
    %c0_5 = arith.constant 0 : index
    %c0_6 = arith.constant 0 : index
    %c0_7 = arith.constant 0 : index
    %c0_8 = arith.constant 0 : index
    %22 = vector.load %arg2[%21, %c0_5, %c0_6, %c0_7, %c0_8] : memref<2x3x4x32x8xf32, #tpu.memory_space<vmem>>, vector<1x1x1x32x8xf32>
    %23 = vector.shape_cast %22 : vector<1x1x1x32x8xf32> to vector<32x8xf32>
    %cst_9 = arith.constant dense<0.000000e+00> : vector<16x8xf32>
    %24 = tpu.matmul %3, %23, %cst_9 {dimension_numbers = #tpu.dot_dimension_numbers<[1], [0], [0], [1], [0, 0, 1, 1], [], []>} : vector<16x32xf32>, vector<32x8xf32>, vector<16x8xf32> -> vector<16x8xf32>
    %25 = arith.index_cast %arg0 : i32 to index
    %c0_10 = arith.constant 0 : index
    %c0_11 = arith.constant 0 : index
    %c0_12 = arith.constant 0 : index
    %c0_13 = arith.constant 0 : index
    %26 = vector.load %arg3[%25, %c0_10, %c0_11, %c0_12, %c0_13] : memref<2x3x4x1x8xf32, #tpu.memory_space<vmem>>, vector<1x1x1x1x8xf32>
    %27 = vector.shape_cast %26 : vector<1x1x1x1x8xf32> to vector<1x8xf32>
    %28 = vector.broadcast %27 : vector<1x8xf32> to vector<16x8xf32>
    %29 = arith.addf %24, %28 : vector<16x8xf32>
    %30 = arith.index_cast %arg0 : i32 to index
    %c1 = arith.constant 1 : index
    %c0_14 = arith.constant 0 : index
    %c0_15 = arith.constant 0 : index
    %c0_16 = arith.constant 0 : index
    %31 = vector.load %arg2[%30, %c1, %c0_14, %c0_15, %c0_16] : memref<2x3x4x32x8xf32, #tpu.memory_space<vmem>>, vector<1x1x1x32x8xf32>
    %32 = vector.shape_cast %31 : vector<1x1x1x32x8xf32> to vector<32x8xf32>
    %cst_17 = arith.constant dense<0.000000e+00> : vector<16x8xf32>
    %33 = tpu.matmul %3, %32, %cst_17 {dimension_numbers = #tpu.dot_dimension_numbers<[1], [0], [0], [1], [0, 0, 1, 1], [], []>} : vector<16x32xf32>, vector<32x8xf32>, vector<16x8xf32> -> vector<16x8xf32>
    %34 = arith.index_cast %arg0 : i32 to index
    %c1_18 = arith.constant 1 : index
    %c0_19 = arith.constant 0 : index
    %c0_20 = arith.constant 0 : index
    %c0_21 = arith.constant 0 : index
    %35 = vector.load %arg3[%34, %c1_18, %c0_19, %c0_20, %c0_21] : memref<2x3x4x1x8xf32, #tpu.memory_space<vmem>>, vector<1x1x1x1x8xf32>
    %36 = vector.shape_cast %35 : vector<1x1x1x1x8xf32> to vector<1x8xf32>
    %37 = vector.broadcast %36 : vector<1x8xf32> to vector<16x8xf32>
    %38 = arith.addf %33, %37 : vector<16x8xf32>
    %39 = arith.index_cast %arg0 : i32 to index
    %c2 = arith.constant 2 : index
    %c0_22 = arith.constant 0 : index
    %c0_23 = arith.constant 0 : index
    %c0_24 = arith.constant 0 : index
    %40 = vector.load %arg2[%39, %c2, %c0_22, %c0_23, %c0_24] : memref<2x3x4x32x8xf32, #tpu.memory_space<vmem>>, vector<1x1x1x32x8xf32>
    %41 = vector.shape_cast %40 : vector<1x1x1x32x8xf32> to vector<32x8xf32>
    %cst_25 = arith.constant dense<0.000000e+00> : vector<16x8xf32>
    %42 = tpu.matmul %3, %41, %cst_25 {dimension_numbers = #tpu.dot_dimension_numbers<[1], [0], [0], [1], [0, 0, 1, 1], [], []>} : vector<16x32xf32>, vector<32x8xf32>, vector<16x8xf32> -> vector<16x8xf32>
    %43 = arith.index_cast %arg0 : i32 to index
    %c2_26 = arith.constant 2 : index
    %c0_27 = arith.constant 0 : index
    %c0_28 = arith.constant 0 : index
    %c0_29 = arith.constant 0 : index
    %44 = vector.load %arg3[%43, %c2_26, %c0_27, %c0_28, %c0_29] : memref<2x3x4x1x8xf32, #tpu.memory_space<vmem>>, vector<1x1x1x1x8xf32>
    %45 = vector.shape_cast %44 : vector<1x1x1x1x8xf32> to vector<1x8xf32>
    %46 = vector.broadcast %45 : vector<1x8xf32> to vector<16x8xf32>
    %47 = arith.addf %42, %46 : vector<16x8xf32>
    %cst_30 = arith.constant dense<0.000000e+00> : vector<16x16xf32>
    %48 = tpu.matmul %29, %38, %cst_30 {dimension_numbers = #tpu.dot_dimension_numbers<[1], [1], [0], [0], [0, 0, 1, 0], [], []>} : vector<16x8xf32>, vector<16x8xf32>, vector<16x16xf32> -> vector<16x16xf32>
    %cst_31 = arith.constant 0.353553385 : f32
    %49 = vector.broadcast %cst_31 : f32 to vector<16x16xf32>
    %50 = arith.mulf %48, %49 : vector<16x16xf32>
    %cst_32 = arith.constant -1.000000e+30 : f32
    %51 = vector.broadcast %cst_32 : f32 to vector<16x16xf32>
    %52 = arith.select %19, %50, %51 : vector<16x16xi1>, vector<16x16xf32>
    %cst_33 = arith.constant dense<0xFF800000> : vector<16xf32>
    %53 = vector.multi_reduction <maximumf>, %52, %cst_33 [1] : vector<16x16xf32> to vector<16xf32>
    %54 = vector.shape_cast %53 : vector<16xf32> to vector<16x1xf32>
    %55 = vector.broadcast %54 : vector<16x1xf32> to vector<16x16xf32>
    %56 = arith.subf %52, %55 : vector<16x16xf32>
    %57 = math.exp %56 : vector<16x16xf32>
    %cst_34 = arith.constant dense<0.000000e+00> : vector<16xf32>
    %58 = vector.multi_reduction <add>, %57, %cst_34 [1] : vector<16x16xf32> to vector<16xf32>
    %59 = vector.shape_cast %58 : vector<16xf32> to vector<16x1xf32>
    %60 = tpu.reciprocal %59 {approx = true} : vector<16x1xf32> -> vector<16x1xf32>
    %61 = vector.broadcast %60 : vector<16x1xf32> to vector<16x16xf32>
    %62 = arith.mulf %57, %61 : vector<16x16xf32>
    %cst_35 = arith.constant dense<0.000000e+00> : vector<16x8xf32>
    %63 = tpu.matmul %62, %47, %cst_35 {dimension_numbers = #tpu.dot_dimension_numbers<[1], [0], [0], [1], [0, 0, 1, 1], [], []>} : vector<16x16xf32>, vector<16x8xf32>, vector<16x8xf32> -> vector<16x8xf32>
    %64 = arith.index_cast %arg0 : i32 to index
    %c0_36 = arith.constant 0 : index
    %c0_37 = arith.constant 0 : index
    %c0_38 = arith.constant 0 : index
    %65 = vector.load %arg4[%64, %c0_36, %c0_37, %c0_38] : memref<2x4x8x32xf32, #tpu.memory_space<vmem>>, vector<1x1x8x32xf32>
    %66 = vector.shape_cast %65 : vector<1x1x8x32xf32> to vector<8x32xf32>
    %cst_39 = arith.constant dense<0.000000e+00> : vector<16x32xf32>
    %67 = tpu.matmul %63, %66, %cst_39 {dimension_numbers = #tpu.dot_dimension_numbers<[1], [0], [0], [1], [0, 0, 1, 1], [], []>} : vector<16x8xf32>, vector<8x32xf32>, vector<16x32xf32> -> vector<16x32xf32>
    %68 = arith.addf %20, %67 : vector<16x32xf32>
    %69 = arith.index_cast %arg0 : i32 to index
    %c0_40 = arith.constant 0 : index
    %c1_41 = arith.constant 1 : index
    %c0_42 = arith.constant 0 : index
    %c0_43 = arith.constant 0 : index
    %70 = vector.load %arg2[%69, %c0_40, %c1_41, %c0_42, %c0_43] : memref<2x3x4x32x8xf32, #tpu.memory_space<vmem>>, vector<1x1x1x32x8xf32>
    %71 = vector.shape_cast %70 : vector<1x1x1x32x8xf32> to vector<32x8xf32>
    %cst_44 = arith.constant dense<0.000000e+00> : vector<16x8xf32>
    %72 = tpu.matmul %3, %71, %cst_44 {dimension_numbers = #tpu.dot_dimension_numbers<[1], [0], [0], [1], [0, 0, 1, 1], [], []>} : vector<16x32xf32>, vector<32x8xf32>, vector<16x8xf32> -> vector<16x8xf32>
    %73 = arith.index_cast %arg0 : i32 to index
    %c0_45 = arith.constant 0 : index
    %c1_46 = arith.constant 1 : index
    %c0_47 = arith.constant 0 : index
    %c0_48 = arith.constant 0 : index
    %74 = vector.load %arg3[%73, %c0_45, %c1_46, %c0_47, %c0_48] : memref<2x3x4x1x8xf32, #tpu.memory_space<vmem>>, vector<1x1x1x1x8xf32>
    %75 = vector.shape_cast %74 : vector<1x1x1x1x8xf32> to vector<1x8xf32>
    %76 = vector.broadcast %75 : vector<1x8xf32> to vector<16x8xf32>
    %77 = arith.addf %72, %76 : vector<16x8xf32>
    %78 = arith.index_cast %arg0 : i32 to index
    %c1_49 = arith.constant 1 : index
    %c1_50 = arith.constant 1 : index
    %c0_51 = arith.constant 0 : index
    %c0_52 = arith.constant 0 : index
    %79 = vector.load %arg2[%78, %c1_49, %c1_50, %c0_51, %c0_52] : memref<2x3x4x32x8xf32, #tpu.memory_space<vmem>>, vector<1x1x1x32x8xf32>
    %80 = vector.shape_cast %79 : vector<1x1x1x32x8xf32> to vector<32x8xf32>
    %cst_53 = arith.constant dense<0.000000e+00> : vector<16x8xf32>
    %81 = tpu.matmul %3, %80, %cst_53 {dimension_numbers = #tpu.dot_dimension_numbers<[1], [0], [0], [1], [0, 0, 1, 1], [], []>} : vector<16x32xf32>, vector<32x8xf32>, vector<16x8xf32> -> vector<16x8xf32>
    %82 = arith.index_cast %arg0 : i32 to index
    %c1_54 = arith.constant 1 : index
    %c1_55 = arith.constant 1 : index
    %c0_56 = arith.constant 0 : index
    %c0_57 = arith.constant 0 : index
    %83 = vector.load %arg3[%82, %c1_54, %c1_55, %c0_56, %c0_57] : memref<2x3x4x1x8xf32, #tpu.memory_space<vmem>>, vector<1x1x1x1x8xf32>
    %84 = vector.shape_cast %83 : vector<1x1x1x1x8xf32> to vector<1x8xf32>
    %85 = vector.broadcast %84 : vector<1x8xf32> to vector<16x8xf32>
    %86 = arith.addf %81, %85 : vector<16x8xf32>
    %87 = arith.index_cast %arg0 : i32 to index
    %c2_58 = arith.constant 2 : index
    %c1_59 = arith.constant 1 : index
    %c0_60 = arith.constant 0 : index
    %c0_61 = arith.constant 0 : index
    %88 = vector.load %arg2[%87, %c2_58, %c1_59, %c0_60, %c0_61] : memref<2x3x4x32x8xf32, #tpu.memory_space<vmem>>, vector<1x1x1x32x8xf32>
    %89 = vector.shape_cast %88 : vector<1x1x1x32x8xf32> to vector<32x8xf32>
    %cst_62 = arith.constant dense<0.000000e+00> : vector<16x8xf32>
    %90 = tpu.matmul %3, %89, %cst_62 {dimension_numbers = #tpu.dot_dimension_numbers<[1], [0], [0], [1], [0, 0, 1, 1], [], []>} : vector<16x32xf32>, vector<32x8xf32>, vector<16x8xf32> -> vector<16x8xf32>
    %91 = arith.index_cast %arg0 : i32 to index
    %c2_63 = arith.constant 2 : index
    %c1_64 = arith.constant 1 : index
    %c0_65 = arith.constant 0 : index
    %c0_66 = arith.constant 0 : index
    %92 = vector.load %arg3[%91, %c2_63, %c1_64, %c0_65, %c0_66] : memref<2x3x4x1x8xf32, #tpu.memory_space<vmem>>, vector<1x1x1x1x8xf32>
    %93 = vector.shape_cast %92 : vector<1x1x1x1x8xf32> to vector<1x8xf32>
    %94 = vector.broadcast %93 : vector<1x8xf32> to vector<16x8xf32>
    %95 = arith.addf %90, %94 : vector<16x8xf32>
    %cst_67 = arith.constant dense<0.000000e+00> : vector<16x16xf32>
    %96 = tpu.matmul %77, %86, %cst_67 {dimension_numbers = #tpu.dot_dimension_numbers<[1], [1], [0], [0], [0, 0, 1, 0], [], []>} : vector<16x8xf32>, vector<16x8xf32>, vector<16x16xf32> -> vector<16x16xf32>
    %cst_68 = arith.constant 0.353553385 : f32
    %97 = vector.broadcast %cst_68 : f32 to vector<16x16xf32>
    %98 = arith.mulf %96, %97 : vector<16x16xf32>
    %cst_69 = arith.constant -1.000000e+30 : f32
    %99 = vector.broadcast %cst_69 : f32 to vector<16x16xf32>
    %100 = arith.select %19, %98, %99 : vector<16x16xi1>, vector<16x16xf32>
    %cst_70 = arith.constant dense<0xFF800000> : vector<16xf32>
    %101 = vector.multi_reduction <maximumf>, %100, %cst_70 [1] : vector<16x16xf32> to vector<16xf32>
    %102 = vector.shape_cast %101 : vector<16xf32> to vector<16x1xf32>
    %103 = vector.broadcast %102 : vector<16x1xf32> to vector<16x16xf32>
    %104 = arith.subf %100, %103 : vector<16x16xf32>
    %105 = math.exp %104 : vector<16x16xf32>
    %cst_71 = arith.constant dense<0.000000e+00> : vector<16xf32>
    %106 = vector.multi_reduction <add>, %105, %cst_71 [1] : vector<16x16xf32> to vector<16xf32>
    %107 = vector.shape_cast %106 : vector<16xf32> to vector<16x1xf32>
    %108 = tpu.reciprocal %107 {approx = true} : vector<16x1xf32> -> vector<16x1xf32>
    %109 = vector.broadcast %108 : vector<16x1xf32> to vector<16x16xf32>
    %110 = arith.mulf %105, %109 : vector<16x16xf32>
    %cst_72 = arith.constant dense<0.000000e+00> : vector<16x8xf32>
    %111 = tpu.matmul %110, %95, %cst_72 {dimension_numbers = #tpu.dot_dimension_numbers<[1], [0], [0], [1], [0, 0, 1, 1], [], []>} : vector<16x16xf32>, vector<16x8xf32>, vector<16x8xf32> -> vector<16x8xf32>
    %112 = arith.index_cast %arg0 : i32 to index
    %c1_73 = arith.constant 1 : index
    %c0_74 = arith.constant 0 : index
    %c0_75 = arith.constant 0 : index
    %113 = vector.load %arg4[%112, %c1_73, %c0_74, %c0_75] : memref<2x4x8x32xf32, #tpu.memory_space<vmem>>, vector<1x1x8x32xf32>
    %114 = vector.shape_cast %113 : vector<1x1x8x32xf32> to vector<8x32xf32>
    %cst_76 = arith.constant dense<0.000000e+00> : vector<16x32xf32>
    %115 = tpu.matmul %111, %114, %cst_76 {dimension_numbers = #tpu.dot_dimension_numbers<[1], [0], [0], [1], [0, 0, 1, 1], [], []>} : vector<16x8xf32>, vector<8x32xf32>, vector<16x32xf32> -> vector<16x32xf32>
    %116 = arith.addf %68, %115 : vector<16x32xf32>
    %117 = arith.index_cast %arg0 : i32 to index
    %c0_77 = arith.constant 0 : index
    %c2_78 = arith.constant 2 : index
    %c0_79 = arith.constant 0 : index
    %c0_80 = arith.constant 0 : index
    %118 = vector.load %arg2[%117, %c0_77, %c2_78, %c0_79, %c0_80] : memref<2x3x4x32x8xf32, #tpu.memory_space<vmem>>, vector<1x1x1x32x8xf32>
    %119 = vector.shape_cast %118 : vector<1x1x1x32x8xf32> to vector<32x8xf32>
    %cst_81 = arith.constant dense<0.000000e+00> : vector<16x8xf32>
    %120 = tpu.matmul %3, %119, %cst_81 {dimension_numbers = #tpu.dot_dimension_numbers<[1], [0], [0], [1], [0, 0, 1, 1], [], []>} : vector<16x32xf32>, vector<32x8xf32>, vector<16x8xf32> -> vector<16x8xf32>
    %121 = arith.index_cast %arg0 : i32 to index
    %c0_82 = arith.constant 0 : index
    %c2_83 = arith.constant 2 : index
    %c0_84 = arith.constant 0 : index
    %c0_85 = arith.constant 0 : index
    %122 = vector.load %arg3[%121, %c0_82, %c2_83, %c0_84, %c0_85] : memref<2x3x4x1x8xf32, #tpu.memory_space<vmem>>, vector<1x1x1x1x8xf32>
    %123 = vector.shape_cast %122 : vector<1x1x1x1x8xf32> to vector<1x8xf32>
    %124 = vector.broadcast %123 : vector<1x8xf32> to vector<16x8xf32>
    %125 = arith.addf %120, %124 : vector<16x8xf32>
    %126 = arith.index_cast %arg0 : i32 to index
    %c1_86 = arith.constant 1 : index
    %c2_87 = arith.constant 2 : index
    %c0_88 = arith.constant 0 : index
    %c0_89 = arith.constant 0 : index
    %127 = vector.load %arg2[%126, %c1_86, %c2_87, %c0_88, %c0_89] : memref<2x3x4x32x8xf32, #tpu.memory_space<vmem>>, vector<1x1x1x32x8xf32>
    %128 = vector.shape_cast %127 : vector<1x1x1x32x8xf32> to vector<32x8xf32>
    %cst_90 = arith.constant dense<0.000000e+00> : vector<16x8xf32>
    %129 = tpu.matmul %3, %128, %cst_90 {dimension_numbers = #tpu.dot_dimension_numbers<[1], [0], [0], [1], [0, 0, 1, 1], [], []>} : vector<16x32xf32>, vector<32x8xf32>, vector<16x8xf32> -> vector<16x8xf32>
    %130 = arith.index_cast %arg0 : i32 to index
    %c1_91 = arith.constant 1 : index
    %c2_92 = arith.constant 2 : index
    %c0_93 = arith.constant 0 : index
    %c0_94 = arith.constant 0 : index
    %131 = vector.load %arg3[%130, %c1_91, %c2_92, %c0_93, %c0_94] : memref<2x3x4x1x8xf32, #tpu.memory_space<vmem>>, vector<1x1x1x1x8xf32>
    %132 = vector.shape_cast %131 : vector<1x1x1x1x8xf32> to vector<1x8xf32>
    %133 = vector.broadcast %132 : vector<1x8xf32> to vector<16x8xf32>
    %134 = arith.addf %129, %133 : vector<16x8xf32>
    %135 = arith.index_cast %arg0 : i32 to index
    %c2_95 = arith.constant 2 : index
    %c2_96 = arith.constant 2 : index
    %c0_97 = arith.constant 0 : index
    %c0_98 = arith.constant 0 : index
    %136 = vector.load %arg2[%135, %c2_95, %c2_96, %c0_97, %c0_98] : memref<2x3x4x32x8xf32, #tpu.memory_space<vmem>>, vector<1x1x1x32x8xf32>
    %137 = vector.shape_cast %136 : vector<1x1x1x32x8xf32> to vector<32x8xf32>
    %cst_99 = arith.constant dense<0.000000e+00> : vector<16x8xf32>
    %138 = tpu.matmul %3, %137, %cst_99 {dimension_numbers = #tpu.dot_dimension_numbers<[1], [0], [0], [1], [0, 0, 1, 1], [], []>} : vector<16x32xf32>, vector<32x8xf32>, vector<16x8xf32> -> vector<16x8xf32>
    %139 = arith.index_cast %arg0 : i32 to index
    %c2_100 = arith.constant 2 : index
    %c2_101 = arith.constant 2 : index
    %c0_102 = arith.constant 0 : index
    %c0_103 = arith.constant 0 : index
    %140 = vector.load %arg3[%139, %c2_100, %c2_101, %c0_102, %c0_103] : memref<2x3x4x1x8xf32, #tpu.memory_space<vmem>>, vector<1x1x1x1x8xf32>
    %141 = vector.shape_cast %140 : vector<1x1x1x1x8xf32> to vector<1x8xf32>
    %142 = vector.broadcast %141 : vector<1x8xf32> to vector<16x8xf32>
    %143 = arith.addf %138, %142 : vector<16x8xf32>
    %cst_104 = arith.constant dense<0.000000e+00> : vector<16x16xf32>
    %144 = tpu.matmul %125, %134, %cst_104 {dimension_numbers = #tpu.dot_dimension_numbers<[1], [1], [0], [0], [0, 0, 1, 0], [], []>} : vector<16x8xf32>, vector<16x8xf32>, vector<16x16xf32> -> vector<16x16xf32>
    %cst_105 = arith.constant 0.353553385 : f32
    %145 = vector.broadcast %cst_105 : f32 to vector<16x16xf32>
    %146 = arith.mulf %144, %145 : vector<16x16xf32>
    %cst_106 = arith.constant -1.000000e+30 : f32
    %147 = vector.broadcast %cst_106 : f32 to vector<16x16xf32>
    %148 = arith.select %19, %146, %147 : vector<16x16xi1>, vector<16x16xf32>
    %cst_107 = arith.constant dense<0xFF800000> : vector<16xf32>
    %149 = vector.multi_reduction <maximumf>, %148, %cst_107 [1] : vector<16x16xf32> to vector<16xf32>
    %150 = vector.shape_cast %149 : vector<16xf32> to vector<16x1xf32>
    %151 = vector.broadcast %150 : vector<16x1xf32> to vector<16x16xf32>
    %152 = arith.subf %148, %151 : vector<16x16xf32>
    %153 = math.exp %152 : vector<16x16xf32>
    %cst_108 = arith.constant dense<0.000000e+00> : vector<16xf32>
    %154 = vector.multi_reduction <add>, %153, %cst_108 [1] : vector<16x16xf32> to vector<16xf32>
    %155 = vector.shape_cast %154 : vector<16xf32> to vector<16x1xf32>
    %156 = tpu.reciprocal %155 {approx = true} : vector<16x1xf32> -> vector<16x1xf32>
    %157 = vector.broadcast %156 : vector<16x1xf32> to vector<16x16xf32>
    %158 = arith.mulf %153, %157 : vector<16x16xf32>
    %cst_109 = arith.constant dense<0.000000e+00> : vector<16x8xf32>
    %159 = tpu.matmul %158, %143, %cst_109 {dimension_numbers = #tpu.dot_dimension_numbers<[1], [0], [0], [1], [0, 0, 1, 1], [], []>} : vector<16x16xf32>, vector<16x8xf32>, vector<16x8xf32> -> vector<16x8xf32>
    %160 = arith.index_cast %arg0 : i32 to index
    %c2_110 = arith.constant 2 : index
    %c0_111 = arith.constant 0 : index
    %c0_112 = arith.constant 0 : index
    %161 = vector.load %arg4[%160, %c2_110, %c0_111, %c0_112] : memref<2x4x8x32xf32, #tpu.memory_space<vmem>>, vector<1x1x8x32xf32>
    %162 = vector.shape_cast %161 : vector<1x1x8x32xf32> to vector<8x32xf32>
    %cst_113 = arith.constant dense<0.000000e+00> : vector<16x32xf32>
    %163 = tpu.matmul %159, %162, %cst_113 {dimension_numbers = #tpu.dot_dimension_numbers<[1], [0], [0], [1], [0, 0, 1, 1], [], []>} : vector<16x8xf32>, vector<8x32xf32>, vector<16x32xf32> -> vector<16x32xf32>
    %164 = arith.addf %116, %163 : vector<16x32xf32>
    %165 = arith.index_cast %arg0 : i32 to index
    %c0_114 = arith.constant 0 : index
    %c3 = arith.constant 3 : index
    %c0_115 = arith.constant 0 : index
    %c0_116 = arith.constant 0 : index
    %166 = vector.load %arg2[%165, %c0_114, %c3, %c0_115, %c0_116] : memref<2x3x4x32x8xf32, #tpu.memory_space<vmem>>, vector<1x1x1x32x8xf32>
    %167 = vector.shape_cast %166 : vector<1x1x1x32x8xf32> to vector<32x8xf32>
    %cst_117 = arith.constant dense<0.000000e+00> : vector<16x8xf32>
    %168 = tpu.matmul %3, %167, %cst_117 {dimension_numbers = #tpu.dot_dimension_numbers<[1], [0], [0], [1], [0, 0, 1, 1], [], []>} : vector<16x32xf32>, vector<32x8xf32>, vector<16x8xf32> -> vector<16x8xf32>
    %169 = arith.index_cast %arg0 : i32 to index
    %c0_118 = arith.constant 0 : index
    %c3_119 = arith.constant 3 : index
    %c0_120 = arith.constant 0 : index
    %c0_121 = arith.constant 0 : index
    %170 = vector.load %arg3[%169, %c0_118, %c3_119, %c0_120, %c0_121] : memref<2x3x4x1x8xf32, #tpu.memory_space<vmem>>, vector<1x1x1x1x8xf32>
    %171 = vector.shape_cast %170 : vector<1x1x1x1x8xf32> to vector<1x8xf32>
    %172 = vector.broadcast %171 : vector<1x8xf32> to vector<16x8xf32>
    %173 = arith.addf %168, %172 : vector<16x8xf32>
    %174 = arith.index_cast %arg0 : i32 to index
    %c1_122 = arith.constant 1 : index
    %c3_123 = arith.constant 3 : index
    %c0_124 = arith.constant 0 : index
    %c0_125 = arith.constant 0 : index
    %175 = vector.load %arg2[%174, %c1_122, %c3_123, %c0_124, %c0_125] : memref<2x3x4x32x8xf32, #tpu.memory_space<vmem>>, vector<1x1x1x32x8xf32>
    %176 = vector.shape_cast %175 : vector<1x1x1x32x8xf32> to vector<32x8xf32>
    %cst_126 = arith.constant dense<0.000000e+00> : vector<16x8xf32>
    %177 = tpu.matmul %3, %176, %cst_126 {dimension_numbers = #tpu.dot_dimension_numbers<[1], [0], [0], [1], [0, 0, 1, 1], [], []>} : vector<16x32xf32>, vector<32x8xf32>, vector<16x8xf32> -> vector<16x8xf32>
    %178 = arith.index_cast %arg0 : i32 to index
    %c1_127 = arith.constant 1 : index
    %c3_128 = arith.constant 3 : index
    %c0_129 = arith.constant 0 : index
    %c0_130 = arith.constant 0 : index
    %179 = vector.load %arg3[%178, %c1_127, %c3_128, %c0_129, %c0_130] : memref<2x3x4x1x8xf32, #tpu.memory_space<vmem>>, vector<1x1x1x1x8xf32>
    %180 = vector.shape_cast %179 : vector<1x1x1x1x8xf32> to vector<1x8xf32>
    %181 = vector.broadcast %180 : vector<1x8xf32> to vector<16x8xf32>
    %182 = arith.addf %177, %181 : vector<16x8xf32>
    %183 = arith.index_cast %arg0 : i32 to index
    %c2_131 = arith.constant 2 : index
    %c3_132 = arith.constant 3 : index
    %c0_133 = arith.constant 0 : index
    %c0_134 = arith.constant 0 : index
    %184 = vector.load %arg2[%183, %c2_131, %c3_132, %c0_133, %c0_134] : memref<2x3x4x32x8xf32, #tpu.memory_space<vmem>>, vector<1x1x1x32x8xf32>
    %185 = vector.shape_cast %184 : vector<1x1x1x32x8xf32> to vector<32x8xf32>
    %cst_135 = arith.constant dense<0.000000e+00> : vector<16x8xf32>
    %186 = tpu.matmul %3, %185, %cst_135 {dimension_numbers = #tpu.dot_dimension_numbers<[1], [0], [0], [1], [0, 0, 1, 1], [], []>} : vector<16x32xf32>, vector<32x8xf32>, vector<16x8xf32> -> vector<16x8xf32>
    %187 = arith.index_cast %arg0 : i32 to index
    %c2_136 = arith.constant 2 : index
    %c3_137 = arith.constant 3 : index
    %c0_138 = arith.constant 0 : index
    %c0_139 = arith.constant 0 : index
    %188 = vector.load %arg3[%187, %c2_136, %c3_137, %c0_138, %c0_139] : memref<2x3x4x1x8xf32, #tpu.memory_space<vmem>>, vector<1x1x1x1x8xf32>
    %189 = vector.shape_cast %188 : vector<1x1x1x1x8xf32> to vector<1x8xf32>
    %190 = vector.broadcast %189 : vector<1x8xf32> to vector<16x8xf32>
    %191 = arith.addf %186, %190 : vector<16x8xf32>
    %cst_140 = arith.constant dense<0.000000e+00> : vector<16x16xf32>
    %192 = tpu.matmul %173, %182, %cst_140 {dimension_numbers = #tpu.dot_dimension_numbers<[1], [1], [0], [0], [0, 0, 1, 0], [], []>} : vector<16x8xf32>, vector<16x8xf32>, vector<16x16xf32> -> vector<16x16xf32>
    %cst_141 = arith.constant 0.353553385 : f32
    %193 = vector.broadcast %cst_141 : f32 to vector<16x16xf32>
    %194 = arith.mulf %192, %193 : vector<16x16xf32>
    %cst_142 = arith.constant -1.000000e+30 : f32
    %195 = vector.broadcast %cst_142 : f32 to vector<16x16xf32>
    %196 = arith.select %19, %194, %195 : vector<16x16xi1>, vector<16x16xf32>
    %cst_143 = arith.constant dense<0xFF800000> : vector<16xf32>
    %197 = vector.multi_reduction <maximumf>, %196, %cst_143 [1] : vector<16x16xf32> to vector<16xf32>
    %198 = vector.shape_cast %197 : vector<16xf32> to vector<16x1xf32>
    %199 = vector.broadcast %198 : vector<16x1xf32> to vector<16x16xf32>
    %200 = arith.subf %196, %199 : vector<16x16xf32>
    %201 = math.exp %200 : vector<16x16xf32>
    %cst_144 = arith.constant dense<0.000000e+00> : vector<16xf32>
    %202 = vector.multi_reduction <add>, %201, %cst_144 [1] : vector<16x16xf32> to vector<16xf32>
    %203 = vector.shape_cast %202 : vector<16xf32> to vector<16x1xf32>
    %204 = tpu.reciprocal %203 {approx = true} : vector<16x1xf32> -> vector<16x1xf32>
    %205 = vector.broadcast %204 : vector<16x1xf32> to vector<16x16xf32>
    %206 = arith.mulf %201, %205 : vector<16x16xf32>
    %cst_145 = arith.constant dense<0.000000e+00> : vector<16x8xf32>
    %207 = tpu.matmul %206, %191, %cst_145 {dimension_numbers = #tpu.dot_dimension_numbers<[1], [0], [0], [1], [0, 0, 1, 1], [], []>} : vector<16x16xf32>, vector<16x8xf32>, vector<16x8xf32> -> vector<16x8xf32>
    %208 = arith.index_cast %arg0 : i32 to index
    %c3_146 = arith.constant 3 : index
    %c0_147 = arith.constant 0 : index
    %c0_148 = arith.constant 0 : index
    %209 = vector.load %arg4[%208, %c3_146, %c0_147, %c0_148] : memref<2x4x8x32xf32, #tpu.memory_space<vmem>>, vector<1x1x8x32xf32>
    %210 = vector.shape_cast %209 : vector<1x1x8x32xf32> to vector<8x32xf32>
    %cst_149 = arith.constant dense<0.000000e+00> : vector<16x32xf32>
    %211 = tpu.matmul %207, %210, %cst_149 {dimension_numbers = #tpu.dot_dimension_numbers<[1], [0], [0], [1], [0, 0, 1, 1], [], []>} : vector<16x8xf32>, vector<8x32xf32>, vector<16x32xf32> -> vector<16x32xf32>
    %212 = arith.addf %164, %211 : vector<16x32xf32>
    %213 = vector.broadcast %7 : vector<1x32xf32> to vector<16x32xf32>
    %214 = arith.addf %212, %213 : vector<16x32xf32>
    %215 = arith.addf %3, %214 : vector<16x32xf32>
    %cst_150 = arith.constant dense<0.000000e+00> : vector<16xf32>
    %216 = vector.multi_reduction <add>, %215, %cst_150 [1] : vector<16x32xf32> to vector<16xf32>
    %217 = vector.shape_cast %216 : vector<16xf32> to vector<16x1xf32>
    %cst_151 = arith.constant 3.200000e+01 : f32
    %218 = vector.broadcast %cst_151 : f32 to vector<16x1xf32>
    %219 = arith.divf %217, %218 : vector<16x1xf32>
    %220 = vector.broadcast %219 : vector<16x1xf32> to vector<16x32xf32>
    %221 = arith.subf %215, %220 : vector<16x32xf32>
    %222 = arith.mulf %221, %221 : vector<16x32xf32>
    %cst_152 = arith.constant dense<0.000000e+00> : vector<16xf32>
    %223 = vector.multi_reduction <add>, %222, %cst_152 [1] : vector<16x32xf32> to vector<16xf32>
    %224 = vector.shape_cast %223 : vector<16xf32> to vector<16x1xf32>
    %cst_153 = arith.constant 3.200000e+01 : f32
    %225 = vector.broadcast %cst_153 : f32 to vector<16x1xf32>
    %226 = arith.divf %224, %225 : vector<16x1xf32>
    %227 = vector.broadcast %219 : vector<16x1xf32> to vector<16x32xf32>
    %228 = arith.subf %215, %227 : vector<16x32xf32>
    %cst_154 = arith.constant 9.99999974E-6 : f32
    %229 = vector.broadcast %cst_154 : f32 to vector<16x1xf32>
    %230 = arith.addf %226, %229 : vector<16x1xf32>
    %231 = math.rsqrt %230 : vector<16x1xf32>
    %232 = vector.broadcast %231 : vector<16x1xf32> to vector<16x32xf32>
    %233 = arith.mulf %228, %232 : vector<16x32xf32>
    %234 = vector.broadcast %8 : vector<1x32xf32> to vector<16x32xf32>
    %235 = arith.mulf %233, %234 : vector<16x32xf32>
    %236 = vector.broadcast %9 : vector<1x32xf32> to vector<16x32xf32>
    %237 = arith.addf %235, %236 : vector<16x32xf32>
    %238 = arith.truncf %237 : vector<16x32xf32> to vector<16x32xbf16>
    %c0_155 = arith.constant 0 : index
    %c0_156 = arith.constant 0 : index
    %c0_157 = arith.constant 0 : index
    %239 = vector.load %arg8[%c0_155, %c0_156, %c0_157] : memref<1x32x2048xbf16, #tpu.memory_space<vmem>>, vector<1x32x2048xbf16>
    %240 = vector.shape_cast %239 : vector<1x32x2048xbf16> to vector<32x2048xbf16>
    %cst_158 = arith.constant dense<0.000000e+00> : vector<16x2048xf32>
    %241 = tpu.matmul %238, %240, %cst_158 {dimension_numbers = #tpu.dot_dimension_numbers<[1], [0], [0], [1], [0, 0, 1, 1], [], []>} : vector<16x32xbf16>, vector<32x2048xbf16>, vector<16x2048xf32> -> vector<16x2048xf32>
    %242 = arith.index_cast %arg0 : i32 to index
    %c0_159 = arith.constant 0 : index
    %c0_160 = arith.constant 0 : index
    %243 = vector.load %arg6[%242, %c0_159, %c0_160] : memref<2x1x2048xf32, #tpu.memory_space<vmem>>, vector<1x1x2048xf32>
    %244 = vector.shape_cast %243 : vector<1x1x2048xf32> to vector<1x2048xf32>
    %245 = vector.broadcast %244 : vector<1x2048xf32> to vector<16x2048xf32>
    %246 = arith.addf %241, %245 : vector<16x2048xf32>
    %cst_161 = arith.constant 0.000000e+00 : f32
    %247 = vector.broadcast %cst_161 : f32 to vector<16x2048xf32>
    %248 = arith.maximumf %246, %247 : vector<16x2048xf32>
    %249 = arith.truncf %248 : vector<16x2048xf32> to vector<16x2048xbf16>
    %c0_162 = arith.constant 0 : index
    %c0_163 = arith.constant 0 : index
    %c0_164 = arith.constant 0 : index
    %250 = vector.load %arg9[%c0_162, %c0_163, %c0_164] : memref<1x32x2048xbf16, #tpu.memory_space<vmem>>, vector<1x32x2048xbf16>
    %251 = vector.shape_cast %250 : vector<1x32x2048xbf16> to vector<32x2048xbf16>
    %cst_165 = arith.constant dense<0.000000e+00> : vector<16x32xf32>
    %252 = tpu.matmul %249, %251, %cst_165 {dimension_numbers = #tpu.dot_dimension_numbers<[1], [1], [0], [0], [0, 0, 1, 0], [], []>} : vector<16x2048xbf16>, vector<32x2048xbf16>, vector<16x32xf32> -> vector<16x32xf32>
    %253 = vector.broadcast %10 : vector<1x32xf32> to vector<16x32xf32>
    %254 = arith.addf %252, %253 : vector<16x32xf32>
    %255 = arith.addf %237, %254 : vector<16x32xf32>
    %cst_166 = arith.constant dense<0.000000e+00> : vector<16xf32>
    %256 = vector.multi_reduction <add>, %255, %cst_166 [1] : vector<16x32xf32> to vector<16xf32>
    %257 = vector.shape_cast %256 : vector<16xf32> to vector<16x1xf32>
    %cst_167 = arith.constant 3.200000e+01 : f32
    %258 = vector.broadcast %cst_167 : f32 to vector<16x1xf32>
    %259 = arith.divf %257, %258 : vector<16x1xf32>
    %260 = vector.broadcast %259 : vector<16x1xf32> to vector<16x32xf32>
    %261 = arith.subf %255, %260 : vector<16x32xf32>
    %262 = arith.mulf %261, %261 : vector<16x32xf32>
    %cst_168 = arith.constant dense<0.000000e+00> : vector<16xf32>
    %263 = vector.multi_reduction <add>, %262, %cst_168 [1] : vector<16x32xf32> to vector<16xf32>
    %264 = vector.shape_cast %263 : vector<16xf32> to vector<16x1xf32>
    %cst_169 = arith.constant 3.200000e+01 : f32
    %265 = vector.broadcast %cst_169 : f32 to vector<16x1xf32>
    %266 = arith.divf %264, %265 : vector<16x1xf32>
    %267 = vector.broadcast %259 : vector<16x1xf32> to vector<16x32xf32>
    %268 = arith.subf %255, %267 : vector<16x32xf32>
    %cst_170 = arith.constant 9.99999974E-6 : f32
    %269 = vector.broadcast %cst_170 : f32 to vector<16x1xf32>
    %270 = arith.addf %266, %269 : vector<16x1xf32>
    %271 = math.rsqrt %270 : vector<16x1xf32>
    %272 = vector.broadcast %271 : vector<16x1xf32> to vector<16x32xf32>
    %273 = arith.mulf %268, %272 : vector<16x32xf32>
    %274 = vector.broadcast %11 : vector<1x32xf32> to vector<16x32xf32>
    %275 = arith.mulf %273, %274 : vector<16x32xf32>
    %276 = vector.broadcast %12 : vector<1x32xf32> to vector<16x32xf32>
    %277 = arith.addf %275, %276 : vector<16x32xf32>
    %c0_171 = arith.constant 0 : index
    %c0_172 = arith.constant 0 : index
    %278 = vector.load %arg11[%c0_171, %c0_172] : memref<16x32xf32, #tpu.memory_space<vmem>>, vector<16x32xf32>
    tpu.vector_store %arg11[%c0_171, %c0_172], %277 {strides = array<i32>} : memref<16x32xf32, #tpu.memory_space<vmem>>, vector<16x32xf32>,
    %c1_i32_173 = arith.constant 1 : i32
    %279 = arith.cmpi eq, %arg0, %c1_i32_173 : i32
    %280 = arith.extui %279 : i1 to i32
    %c0_i32_174 = arith.constant 0 : i32
    %281 = arith.cmpi ne, %280, %c0_i32_174 : i32
    scf.if %281 {
      %282 = vector.extract_strided_slice %277 {offsets = [14, 0], sizes = [2, 32], strides = [1, 1]} : vector<16x32xf32> to vector<2x32xf32>
      %c0_175 = arith.constant 0 : index
      %c0_176 = arith.constant 0 : index
      %283 = vector.load %arg7[%c0_175, %c0_176] : memref<33x1xf32, #tpu.memory_space<vmem>>, vector<33x1xf32>
      %284 = vector.extract_strided_slice %283 {offsets = [0, 0], sizes = [32, 1], strides = [1, 1]} : vector<33x1xf32> to vector<32x1xf32>
      %cst_177 = arith.constant dense<0.000000e+00> : vector<2x1xf32>
      %285 = tpu.matmul %282, %284, %cst_177 {dimension_numbers = #tpu.dot_dimension_numbers<[1], [0], [0], [1], [0, 0, 1, 1], [], []>} : vector<2x32xf32>, vector<32x1xf32>, vector<2x1xf32> -> vector<2x1xf32>
      %286 = vector.extract_strided_slice %283 {offsets = [32, 0], sizes = [1, 1], strides = [1, 1]} : vector<33x1xf32> to vector<1x1xf32>
      %287 = vector.broadcast %286 : vector<1x1xf32> to vector<2x1xf32>
      %288 = arith.addf %285, %287 : vector<2x1xf32>
      %c0_178 = arith.constant 0 : index
      %c0_179 = arith.constant 0 : index
      %289 = vector.load %arg10[%c0_178, %c0_179] : memref<2x1xf32, #tpu.memory_space<vmem>>, vector<2x1xf32>
      tpu.vector_store %arg10[%c0_178, %c0_179], %288 {strides = array<i32>} : memref<2x1xf32, #tpu.memory_space<vmem>>, vector<2x1xf32>,
    } else {
    }
    return
  }
  func.func @transform_0(%arg0: i32) -> (i32, i32) {
    %c0_i32 = arith.constant 0 : i32
    %c0_i32_0 = arith.constant 0 : i32
    %c0_i32_1 = arith.constant 0 : i32
    return %c0_i32, %c0_i32_0 : i32, i32
  }
  func.func @transform_1(%arg0: i32) -> (i32, i32, i32, i32, i32) {
    %c0_i32 = arith.constant 0 : i32
    %c0_i32_0 = arith.constant 0 : i32
    %c0_i32_1 = arith.constant 0 : i32
    %c0_i32_2 = arith.constant 0 : i32
    %c0_i32_3 = arith.constant 0 : i32
    %c0_i32_4 = arith.constant 0 : i32
    return %c0_i32, %c0_i32_0, %c0_i32_1, %c0_i32_2, %c0_i32_3 : i32, i32, i32, i32, i32
  }
  func.func @transform_2(%arg0: i32) -> (i32, i32, i32, i32, i32) {
    %c0_i32 = arith.constant 0 : i32
    %c0_i32_0 = arith.constant 0 : i32
    %c0_i32_1 = arith.constant 0 : i32
    %c0_i32_2 = arith.constant 0 : i32
    %c0_i32_3 = arith.constant 0 : i32
    %c0_i32_4 = arith.constant 0 : i32
    return %c0_i32, %c0_i32_0, %c0_i32_1, %c0_i32_2, %c0_i32_3 : i32, i32, i32, i32, i32
  }
  func.func @transform_3(%arg0: i32) -> (i32, i32, i32, i32) {
    %c0_i32 = arith.constant 0 : i32
    %c0_i32_0 = arith.constant 0 : i32
    %c0_i32_1 = arith.constant 0 : i32
    %c0_i32_2 = arith.constant 0 : i32
    %c0_i32_3 = arith.constant 0 : i32
    return %c0_i32, %c0_i32_0, %c0_i32_1, %c0_i32_2 : i32, i32, i32, i32
  }
  func.func @transform_4(%arg0: i32) -> (i32, i32, i32) {
    %c0_i32 = arith.constant 0 : i32
    %c0_i32_0 = arith.constant 0 : i32
    %c0_i32_1 = arith.constant 0 : i32
    %c0_i32_2 = arith.constant 0 : i32
    return %c0_i32, %c0_i32_0, %c0_i32_1 : i32, i32, i32
  }
  func.func @transform_5(%arg0: i32) -> (i32, i32, i32) {
    %c0_i32 = arith.constant 0 : i32
    %c0_i32_0 = arith.constant 0 : i32
    %c0_i32_1 = arith.constant 0 : i32
    %c0_i32_2 = arith.constant 0 : i32
    return %c0_i32, %c0_i32_0, %c0_i32_1 : i32, i32, i32
  }
  func.func @transform_6(%arg0: i32) -> (i32, i32) {
    %c0_i32 = arith.constant 0 : i32
    %c0_i32_0 = arith.constant 0 : i32
    %c0_i32_1 = arith.constant 0 : i32
    return %c0_i32, %c0_i32_0 : i32, i32
  }
  func.func @transform_7(%arg0: i32) -> (i32, i32, i32) {
    %c0_i32 = arith.constant 0 : i32
    %c0_i32_0 = arith.constant 0 : i32
    %c0_i32_1 = arith.constant 0 : i32
    return %arg0, %c0_i32, %c0_i32_0 : i32, i32, i32
  }
  func.func @transform_8(%arg0: i32) -> (i32, i32, i32) {
    %c0_i32 = arith.constant 0 : i32
    %c0_i32_0 = arith.constant 0 : i32
    %c0_i32_1 = arith.constant 0 : i32
    return %arg0, %c0_i32, %c0_i32_0 : i32, i32, i32
  }
  func.func @transform_9(%arg0: i32) -> (i32, i32) {
    %c0_i32 = arith.constant 0 : i32
    %c0_i32_0 = arith.constant 0 : i32
    %c0_i32_1 = arith.constant 0 : i32
    return %c0_i32, %c0_i32_0 : i32, i32
  }
}

</mosaic_0001>

<bundles_post_ra>
// kernel: transformer_forward.1
= control target key start
LH: loop header
LB: loop body
LE: loop exit
PB: predicated region body
PF: predicated region fallthrough
CT: control target
= control target key end

     0   :  { %14 = vsyncpa [#allocation4], 0  ;;  %s5824_s0 = inlined_call_operand.hbm [shape: f32[16,32], index: 0, kind: input, shape index: {}]   ;;  %s5825_s1 = inlined_call_operand.vmem [shape: f32[2,3,4,32,8], index: 1, kind: input, shape index: {}]   ;;  %s5826_s2 = inlined_call_operand.hbm [shape: f32[2,3,4,1,8], index: 2, kind: input, shape index: {}]   ;;  %s5827_s3 = inlined_call_operand.hbm [shape: f32[2,4,8,32], index: 3, kind: input, shape index: {}]   ;;  %s5828_s4 = inlined_call_operand.vmem [shape: f32[2,6,32], index: 4, kind: input, shape index: {}]   ;;  %s5829_s5 = inlined_call_operand.hbm [shape: f32[2,1,2048], index: 5, kind: input, shape index: {}]   ;;  %s5830_s6 = inlined_call_operand.vmem [shape: f32[33,1], index: 6, kind: input, shape index: {}]   ;;  %s5831_s7 = inlined_call_operand.vmem [shape: bf16[2,32,2048], index: 7, kind: input, shape index: {}]   ;;  %s5832_s8 = inlined_call_operand.vmem [shape: bf16[2,32,2048], index: 8, kind: input, shape index: {}]   ;;  %s5833_s9 = inlined_call_operand.vmem [shape: f32[2,1], index: 9, kind: output, shape index: {}]  }
   0x1   :  { %15 = vsyncpa [#allocation6], 0 }
   0x2   :  { %16 = vsyncpa [#allocation9], 0  ;;  %s5178_s30 = smov 0  }
   0x3 LB: > { %s5115_s10 = smov [#allocation5]   ;;  %s5184_s12 = sadd.s32 4294967295, %s5113_s30   ;;  %s5113_s30 = sphi %s5178_s30, %s22_s30  }
   0x4   : > { %s275_s11 = sshll.u32 %s5115_s10, 4  ;;  %p4170_p0 = scmp.ge.s32.totalorder %s5113_s30, 1  ;;  %s5190_s11 = int_to_ptr.vmem [resolvable:$true] %s275_s11 }
   0x5   : > { %p247_p1 = scmp.lt.s32.totalorder %s5113_s30, 3  ;;  %p5834_p3 = scmp.eq.s32.totalorder %s5184_s12, 0 }
   0x6   : > { %s5116_s14 = smov [#allocation3]   ;;  %s5117_s17 = smov [#allocation7]  }
   0x7   : > { %p5192_p4 = pnand %p4170_p0, %p247_p1  ;;  %s259_s15 = sshll.u32 %s5116_s14, 4  ;;  %s5198_s15 = int_to_ptr.vmem [resolvable:$true] %s259_s15 }
   0x8   : > { %s5206_s18 = sshll.u32 %s5117_s17, 4  ;;  %s4983_s21 = scalar_lea.hbm %s5826_s2, 384  ;;  %s289_s18 = int_to_ptr.vmem [resolvable:$true] %s5206_s18 }
   0x9   : > { %s5836_s13 = scalar_select %p5192_p4, 1, 0 }
   0xa   : > { %p4901_p5 = pneg %p5192_p4  ;;  %p4984_p7 = scmp.ne.s32.totalorder %s5826_s2, %s4983_s21 }
   0xb   : > { %p4990_p11 = scmp.lt.u32.totalorder %s4983_s21, %s5826_s2 }
   0xc   : > { %p5202_p6 = pnand %p5834_p3, %p4901_p5 }
   0xe   : > { %p5216_p8 = pneg %p5202_p6 }
  0x10   : > { %p4986_p9 = pnand %p5216_p8, %p4984_p7 }
  0x12   : > { %p4987_p10 = pneg %p4986_p9 }
  0x14   : > { %p4992_p12 = pnand %p4990_p11, %p4987_p10 }
  0x16   : > { %4995 = shalt.err (!%p4992_p12)
}
  0x17   : > { %s4996_s27 = scalar_lea.vmem %s5190_s11, 384  ;;  %p5004_p5 = scmp.lt.s32.totalorder %s5190_s11, %s5190_s11 }
  0x18   : > { %p4997_p13 = scmp.ne.s32.totalorder %s5190_s11, %s4996_s27  ;;  %p5005_p2 = scmp.lt.s32.totalorder %s4996_s27, %s4996_s27 }
  0x1a   : > { %p4999_p0 = pnand %p4997_p13, %p5216_p8  ;;  %p5006_p7 = por %p5005_p2, %p5004_p5 }
  0x1c   : > { %p5000_p1 = pneg %p4999_p0 }
  0x1e   : > { %p5007_p9 = pnand %p5006_p7, %p5000_p1 }
  0x20   : > { %5010 = shalt.err (!%p5007_p9)
}
  0x21   : > { %s5118_s28 = smov 16   ;;  %s5119_s29 = smov 1  }
  0x22   : > { %4907 = dma.hbm_to_vmem [thread:$0]  (!%p5202_p6), %s5826_s2, 384, %s5190_s11, [#allocation6], %s5118_s28, %s5118_s28, %s5119_s29  }
  0x23   : > { %s5011_s20 = scalar_lea.hbm %s5824_s0, 256 }
  0x24   : > { %p5012_p2 = scmp.ne.s32.totalorder %s5824_s0, %s5011_s20  ;;  %p5018_p12 = scmp.lt.u32.totalorder %s5011_s20, %s5824_s0 }
  0x26   : > { %p5014_p10 = pnand %p5012_p2, %p5216_p8 }
  0x28   : > { %p5015_p11 = pneg %p5014_p10 }
  0x2a   : > { %p5020_p13 = pnand %p5018_p12, %p5015_p11 }
  0x2c   : > { %5023 = shalt.err (!%p5020_p13)
}
  0x2d   : > { %s5024_s11 = scalar_lea.vmem %s5198_s15, 256  ;;  %p5032_p7 = scmp.lt.s32.totalorder %s5198_s15, %s5198_s15 }
  0x2e   : > { %p5025_p0 = scmp.ne.s32.totalorder %s5198_s15, %s5024_s11  ;;  %p5033_p9 = scmp.lt.s32.totalorder %s5024_s11, %s5024_s11 }
  0x30   : > { %p5027_p1 = pnand %p5025_p0, %p5216_p8  ;;  %p5034_p2 = por %p5033_p9, %p5032_p7 }
  0x32   : > { %p5028_p5 = pneg %p5027_p1 }
  0x34   : > { %p5035_p10 = pnand %p5034_p2, %p5028_p5 }
  0x36   : > { %5038 = shalt.err (!%p5035_p10)
}
  0x37   : > { %s5120_s26 = smov 128   ;;  %s5121_s27 = smov 8  }
  0x38   : > { %4904 = dma.hbm_to_vmem [thread:$0]  (!%p5202_p6), %s5824_s0, 256, %s5198_s15, [#allocation4], %s5120_s26, %s5120_s26, %s5121_s27  }
  0x39   : > { %s5122_s14 = smov [#allocation8]   ;;  %s5039_s21 = scalar_lea.hbm %s5827_s3, 1024 }
  0x3a   : > { %s304_s17 = sshll.u32 %s5122_s14, 4  ;;  %p5040_p11 = scmp.ne.s32.totalorder %s5827_s3, %s5039_s21  ;;  %s305_s17 = int_to_ptr.vmem [resolvable:$true] %s304_s17 }
  0x3b   : > { %p5046_p0 = scmp.lt.u32.totalorder %s5039_s21, %s5827_s3 }
  0x3c   : > { %p5042_p12 = pnand %p5040_p11, %p5216_p8 }
  0x3e   : > { %p5043_p13 = pneg %p5042_p12 }
  0x40   : > { %p5048_p1 = pnand %p5046_p0, %p5043_p13 }
  0x42   : > { %5051 = shalt.err (!%p5048_p1)
}
  0x43   : > { %s5052_s15 = scalar_lea.vmem %s289_s18, 1024  ;;  %p5060_p2 = scmp.lt.s32.totalorder %s289_s18, %s289_s18 }
  0x44   : > { %p5053_p5 = scmp.ne.s32.totalorder %s289_s18, %s5052_s15  ;;  %p5061_p10 = scmp.lt.s32.totalorder %s5052_s15, %s5052_s15 }
  0x46   : > { %p5055_p7 = pnand %p5053_p5, %p5216_p8  ;;  %p5062_p3 = por %p5061_p10, %p5060_p2 }
  0x48   : > { %p5056_p9 = pneg %p5055_p7 }
  0x4a   : > { %p5063_p4 = pnand %p5062_p3, %p5056_p9 }
  0x4c   : > { %5066 = shalt.err (!%p5063_p4)
}
  0x4d   : > { %4910 = dma.hbm_to_vmem [thread:$0]  (!%p5202_p6), %s5827_s3, 1024, %s289_s18, [#allocation6], %s5120_s26, %s5120_s26, %s5121_s27  }
  0x4e   : > { %s5067_s20 = scalar_lea.hbm %s5829_s5, 512 }
  0x4f   : > { %p5068_p11 = scmp.ne.s32.totalorder %s5829_s5, %s5067_s20  ;;  %p5074_p4 = scmp.lt.u32.totalorder %s5067_s20, %s5829_s5 }
  0x51   : > { %p5070_p12 = pnand %p5068_p11, %p5216_p8 }
  0x53   : > { %p5071_p3 = pneg %p5070_p12 }
  0x55   : > { %p5076_p13 = pnand %p5074_p4, %p5071_p3 }
  0x57   : > { %5079 = shalt.err (!%p5076_p13)
}
  0x58   : > { %s5080_s11 = scalar_lea.vmem %s305_s17, 512  ;;  %p5088_p7 = scmp.lt.s32.totalorder %s305_s17, %s305_s17 }
  0x59   : > { %p5081_p0 = scmp.ne.s32.totalorder %s305_s17, %s5080_s11  ;;  %p5089_p9 = scmp.lt.s32.totalorder %s5080_s11, %s5080_s11 }
  0x5b   : > { %p5083_p1 = pnand %p5081_p0, %p5216_p8  ;;  %p5090_p2 = por %p5089_p9, %p5088_p7 }
  0x5d   : > { %p5084_p5 = pneg %p5083_p1 }
  0x5f   : > { %p5091_p10 = pnand %p5090_p2, %p5084_p5 }
  0x61   : > { %5094 = shalt.err (!%p5091_p10)
}
  0x62   : > { %s5123_s18 = smov 256   ;;  %p5839_p11 = scmp.ne.s32.totalorder %s5836_s13, 0 }
  0x63   : > { %4913 = dma.hbm_to_vmem [thread:$0]  (!%p5202_p6), %s5829_s5, 512, %s305_s17, [#allocation9], %s5123_s18, %s5123_s18, %s5118_s28  }
  0x64   : > { %339 = sbr.rel (%p5839_p11) target bundleno = 5383 (0x1507), region = 56  ;;  %p5840_p12 = scmp.eq.s32.totalorder (!%p5839_p11), %s5184_s12, 0 }
  0x6b   : > { %5100 = dma.done.wait (%p5840_p12), [#allocation4], 256   ;;  %p5841_p8 = pmov %p5840_p12 }
  0x6d   : > { %5102 = vsyncadd (%p5841_p8), [#allocation4], 4294967040  ;;  %p5842_p3 = pmov %p5841_p8 }
  0x6f   : > { %5104 = dma.done.wait (%p5842_p3), [#allocation6], 1408   ;;  %p5843_p4 = pmov %p5842_p3 }
  0x70   : > { %p5844_p13 = pmov %p5842_p3 }
  0x71   : > { %5106 = vsyncadd (%p5843_p4), [#allocation6], 4294965888 }
  0x72   : > { %5108 = dma.done.wait (%p5844_p13), [#allocation9], 512   ;;  %p5845_p6 = pmov %p5842_p3 }
  0x73   : > { %p387_p0 = scmp.lt.s32.totalorder %s5184_s12, 1  ;;  %p5846_p1 = scmp.ne.s32.totalorder %s5184_s12, 0 }
  0x74   : > { %5110 = vsyncadd (%p5845_p6), [#allocation9], 4294966784  ;;  %v402_v0 = vld [vmem:[#allocation3] sm:$0xff] (!%p5846_p1)  ;;  %vm404_vm0 = vcmask (!%p5846_p1), 261120   ;;  %v403_v1 = vld [vmem:[#allocation3 + $0x8] sm:$0xff] (!%p5846_p1) }
  0x75   : > { %s388_s13 = scalar_select %p387_p0, %s5184_s12, 1 }
  0x76   : > { %401 = sbr.rel (%p5846_p1) target bundleno = 125 (0x7d), region = 76  ;;  %405 = vst.msk [vmem:[#allocation2] sm:$0xff] (!%p5846_p1), %vm404_vm0, %v402_v0  ;;  %406 = vst.msk [vmem:[#allocation2 + $0x8] sm:$0xff] (!%p5846_p1), %vm404_vm0, %v403_v1 }
  0x77   : > { %s4395_s16 = sshll.u32 %s388_s13, 8 }
  0x78   : > { %s5319_s17 = scalar_lea.vmem %s5831_s7, %s4395_s16  ;;  %s5324_s10 = scalar_lea.vmem %s5832_s8, %s4395_s16 }
  0x7d PF: > { %s422_s14 = smul.u32 384, %s5184_s12  ;;  %v5329_v2 = vld [vmem:[#allocation2] sm:$0xff]  ;;  %vm437_vm1 = vcmask 261120   ;;  %v5348_v15 = vld [vmem:[#allocation2 + $0x8] sm:$0xff]  ;;  %vm699_vm2 = vcmask 64512   ;;  %v412_v34 = vlaneseq  ;;  %vm791_vm5 = vcmask 130048  }
  0x7e   : > { %4537 = vmatprep.mubr.msk.f32.mxu1 %vm437_vm1, %v5329_v2  ;;  %4526 = vmatprep.mubr.msk.f32.mxu0 %vm437_vm1, %v5329_v2  ;;  %s428_s22 = smul.u32 12, %s5184_s12  ;;  %vm5363_vm3 = vmpackc.low %vm699_vm2, %vm699_vm2  ;;  %s4212_s25 = sshll.u32 %s5184_s12, 5 }
  0x7f   : > { %s5338_s21 = scalar_lea.vmem %s5825_s1, %s422_s14  ;;  %v5381_v35 = vshrl.u32 %v412_v34, 7  ;;  %v416_v36 = vand.u32 127, %v412_v34  ;;  %s5448_s11 = scalar_lea.vmem [#allocation7], %s4212_s25 }
  0x80   : > { %v4190_v3 = vld [vmem:[%s5338_s21 + $0x80] sm:$0xff]  ;;  %v4191_v4 = vld [vmem:[%s5338_s21 + $0x88] sm:$0xff]  ;;  %v4192_v5 = vld [vmem:[%s5338_s21 + $0x90] sm:$0xff]  ;;  %s5357_s23 = scalar_lea.vmem [#allocation5], %s428_s22  ;;  %s4186_s18 = sshll.u32 %s5184_s12, 3 }
  0x81   : > { %v4745_v6 = vpack.c.bf16 %v4191_v4, %v4190_v3  ;;  %v4193_v7 = vld [vmem:[%s5338_s21 + $0x98] sm:$0xff]  ;;  %v424_v8 = vld [vmem:[%s5338_s21] sm:$0xff]  ;;  %v425_v9 = vld [vmem:[%s5338_s21 + $0x8] sm:$0xff]  ;;  %v414_v37 = vadd.s32 8, %v5381_v35  ;;  %v417_v38 = vand.u32 1, %v5381_v35  ;;  %v419_v39 = vand.u32 1, %v416_v36  ;;  %s410_s13 = scalar_lea.vmem %s5828_s4, %s4186_s18 }
  0x82   : > { %v4749_v10 = vpack.c.bf16 %v4193_v7, %v4192_v5  ;;  %v4737_v11 = vpack.c.bf16 %v425_v9, %v424_v8  ;;  %v426_v12 = vld [vmem:[%s5338_s21 + $0x10] sm:$0xff]  ;;  %v427_v13 = vld [vmem:[%s5338_s21 + $0x18] sm:$0xff]  ;;  %v4195_v16 = vld [vmem:[%s5357_s23 + $0x4] ss:$0 sm:$0xff]  ;;  %s4317_s16 = sshll.u32 %s5184_s12, 4  ;;  %p4390_p5 = scmp.ne.s32.totalorder %s5184_s12, 1 }
  0x83   : > { %4746 = vmatprep.subr.bf16.mxu1 %v4745_v6  ;;  %v4741_v14 = vpack.c.bf16 %v427_v13, %v426_v12  ;;  %v4187_v18 = vld [vmem:[%s5357_s23] ss:$0 sm:$0xff]  ;;  %v4199_v29 = vld [vmem:[%s5338_s21 + $0x108] sm:$0xff]  ;;  %v4200_v30 = vld [vmem:[%s5338_s21 + $0x110] sm:$0xff]  ;;  %v418_v40 = vand.u32 1, %v414_v37  ;;  %vm5385_vm4 = vcmp.eq.s32.totalorder %v417_v38, %v419_v39  ;;  %s5672_s24 = scalar_lea.vmem [#allocation8], %s4317_s16 }
  0x84   : > { %4748 = vmatpush3.bf16.msra.mxu1 %v4745_v6  ;;  %4738 = vmatprep.subr.bf16.mxu0 %v4737_v11  ;;  %v4198_v28 = vld [vmem:[%s5338_s21 + $0x100] sm:$0xff]  ;;  %v4201_v32 = vld [vmem:[%s5338_s21 + $0x118] sm:$0xff]  ;;  %v4222_v62 = vld [vmem:[%s5338_s21 + $0xa8] sm:$0xff]  ;;  %vm5126_vm7 = vmmov (!%p4390_p5), 0   ;;  %vm4001_vm8 = vcmask (!%p4390_p5), 1024  }
  0x85   : > { %4750 = vmatprep.subr.bf16.mxu1 %v4749_v10  ;;  %4740 = vmatpush3.bf16.msra.mxu0 %v4737_v11  ;;  %v4753_v31 = vpack.c.bf16 %v4199_v29, %v4198_v28  ;;  %v4757_v33 = vpack.c.bf16 %v4201_v32, %v4200_v30  ;;  %vm5389_vm6 = vcmp.eq.s32.totalorder %v418_v40, %v419_v39  ;;  %v4221_v61 = vld [vmem:[%s5338_s21 + $0xa0] sm:$0xff]  ;;  %v4203_v1 = vld [vmem:[%s5357_s23 + $0x8] ss:$0 sm:$0xff]  ;;  %v4223_v6 = vld [vmem:[%s5338_s21 + $0xb0] sm:$0xff] }
  0x86   : > { %4742 = vmatprep.subr.bf16.mxu0 %v4741_v14  ;;  %v4779_v63 = vpack.c.bf16 %v4222_v62, %v4221_v61  ;;  %v4224_v7 = vld [vmem:[%s5338_s21 + $0xb8] sm:$0xff]  ;;  %v4214_v11 = vld [vmem:[%s5338_s21 + $0x28] sm:$0xff]  ;;  %v4218_v32 = vld [vmem:[%s5357_s23 + $0x1] ss:$0 sm:$0xff] }
  0x87   : > { %v4783_v8 = vpack.c.bf16 %v4224_v7, %v4223_v6  ;;  %v4229_v38 = vld [vmem:[%s5338_s21 + $0x120] sm:$0xff]  ;;  %v4230_v39 = vld [vmem:[%s5338_s21 + $0x128] sm:$0xff]  ;;  %v4231_v40 = vld [vmem:[%s5338_s21 + $0x130] sm:$0xff] }
  0x88   : > { %4752 = vmatpush3.bf16.msra.mxu1 %v4749_v10  ;;  %v4213_v10 = vld [vmem:[%s5338_s21 + $0x20] sm:$0xff]  ;;  %v4244_v7 = vld [vmem:[%s5448_s11 + $0x8] sm:$0xff] }
  0x89   : > { %4744 = vmatpush3.bf16.msra.mxu0 %v4741_v14  ;;  %v4771_v12 = vpack.c.bf16 %v4214_v11, %v4213_v10 }
  0x8a   : > { %4754 = vmatprep.subr.bf16.mxu0 %v4753_v31 }
  0x8b   : > { %4538 = vmatmul.mubr.msk.f32.vlgmr.msra.gmra.mrb[0].mxu1 %vm437_vm1, %v5348_v15 }
  0x8c   : > { %4527 = vmatmul.mubr.msk.f32.vlgmr.msra.gmra.mrb[0].mxu0 %vm437_vm1, %v5348_v15 }
  0x8d   : > { %4548 = vmatprep.mubr.msk.f32.mxu0 %vm437_vm1, %v5329_v2  ;;  %4756 = vmatpush3.bf16.msra.mxu0 %v4753_v31 }
  0x8e   : > { %4758 = vmatprep.subr.bf16.mxu0 %v4757_v33 }
  0x91   : > { %4760 = vmatpush3.bf16.msra.mxu0 %v4757_v33 }
  0x92   : > { %4780 = vmatprep.subr.bf16.mxu0 %v4779_v63 }
  0x94   : > { %4549 = vmatmul.mubr.msk.f32.vlgmr.msra.gmra.mrb[2].mxu0 %vm437_vm1, %v5348_v15 }
  0x95   : > { %4584 = vmatprep.mubr.msk.f32.mxu0 %vm437_vm1, %v5329_v2  ;;  %4782 = vmatpush3.bf16.msra.mxu0 %v4779_v63 }
  0x96   : > { %4784 = vmatprep.subr.bf16.mxu0 %v4783_v8 }
  0x99   : > { %4786 = vmatpush3.bf16.msra.mxu0 %v4783_v8 }
  0x9c   : > { %4585 = vmatmul.mubr.msk.f32.vlgmr.msra.gmra.mrb[4].mxu0 %vm437_vm1, %v5348_v15 }
 0x15e   : > { %v4539_v17 = vpop.f32.mrb[0].mxu1 }
 0x15f   : > { %v606_v19 = vadd.f32 %v4539_v17, %v4195_v16  ;;  %v600_v20 = vpop.f32.mrb[1].mxu1  ;;  %v4528_v21 = vpop.f32.mrb[0].mxu0 }
 0x160   : > { %v601_v22 = vadd.f32 %v4195_v16, %v600_v20  ;;  %v510_v23 = vpop.f32.mrb[1].mxu0  ;;  %v516_v27 = vadd.f32 %v4528_v21, %v4187_v18 }
 0x161   : > { %v511_v25 = vadd.f32 %v4187_v18, %v510_v23  ;;  %v4215_v18 = vld [vmem:[%s5338_s21 + $0x30] sm:$0xff]  ;;  %v4226_v23 = vld [vmem:[%s5357_s23 + $0x5] ss:$0 sm:$0xff] }
 0x162   : > { %v4761_v26 = vpack.c.bf16 %v606_v19, %v601_v22  ;;  %v4216_v19 = vld [vmem:[%s5338_s21 + $0x38] sm:$0xff] }
 0x163   : > { %4555 = vmatprep.mubr.msk.f32.mxu1 %vm699_vm2, %v511_v25  ;;  %v4775_v22 = vpack.c.bf16 %v4216_v19, %v4215_v18  ;;  %v4251_v19 = vld [vmem:[%s5338_s21 + $0x50] sm:$0xff] }
 0x164   : > { %4763 = vmatprep.subr.msk.bf16.mxu1 %vm5363_vm3, %v4761_v26 }
 0x165   : > { %4766 = vmatpush3.bf16.xpose.msk.msra.mxu1 %vm5363_vm3, %v4761_v26 }
 0x167   : > { %v4550_v0 = vpop.f32.mrb[2].mxu0 }
 0x168   : > { %v690_v3 = vpop.f32.mrb[3].mxu0  ;;  %v696_v4 = vadd.f32 %v4550_v0, %v4203_v1 }
 0x169   : > { %v691_v5 = vadd.f32 %v4203_v1, %v690_v3  ;;  %v4234_v1 = vld [vmem:[%s5357_s23 + $0x9] ss:$0 sm:$0xff] }
 0x16b   : > { %v4767_v9 = vpack.c.bf16 %v696_v4, %v691_v5 }
 0x16c   : > { %4556 = vmatmul.mubr.msk.f32.vlgmr.msra.gmra.mrb[2].mxu1 %vm699_vm2, %v516_v27 }
 0x16d   : > { %4768 = vmatprep.subr.bf16.mxu1 %v4767_v9 }
 0x16e   : > { %4770 = vmatpush3.bf16.msra.mxu1 %v4767_v9 }
 0x16f   : > { %4772 = vmatprep.subr.bf16.mxu1 %v4771_v12  ;;  %v4586_v25 = vpop.f32.mrb[4].mxu0 }
 0x170   : > { %v1075_v26 = vadd.f32 %v4586_v25, %v4226_v23  ;;  %v1069_v27 = vpop.f32.mrb[5].mxu0 }
 0x171   : > { %v1070_v28 = vadd.f32 %v4226_v23, %v1069_v27  ;;  %v4258_v23 = vld [vmem:[%s5338_s21 + $0xc8] sm:$0xff] }
 0x173   : > { %v4795_v29 = vpack.c.bf16 %v1075_v26, %v1070_v28  ;;  %v4259_v28 = vld [vmem:[%s5338_s21 + $0xd0] sm:$0xff] }
 0x175   : > { %4797 = vmatprep.subr.msk.bf16.mxu0 %vm5363_vm3, %v4795_v29 }
 0x176   : > { %4800 = vmatpush3.bf16.xpose.msk.msra.mxu0 %vm5363_vm3, %v4795_v29  ;;  %v4260_v29 = vld [vmem:[%s5338_s21 + $0xd8] sm:$0xff] }
 0x177   : > { %4612 = vmatprep.subr.mxu0 %v4244_v7 }
 0x23f   : > { %v4557_v41 = vpop.f32.mrb[2].mxu1 }
 0x240   : > { %v778_v42 = vpop.f32.mrb[3].mxu1  ;;  %v788_v44 = vmul.f32 0.35355338, %v4557_v41  ;;  %v4787_v41 = vpack.c.bf16 %v4230_v39, %v4229_v38 }
 0x241   : > { %v787_v45 = vmul.f32 0.35355338, %v778_v42  ;;  %v4232_v42 = vld [vmem:[%s5338_s21 + $0x138] sm:$0xff] }
 0x242   : > { %v790_v49 = vsel %vm5389_vm6, %v788_v44, -1e+30  ;;  %v4791_v44 = vpack.c.bf16 %v4232_v42, %v4231_v40 }
 0x243   : > { %v789_v47 = vsel %vm5385_vm4, %v787_v45, -1e+30  ;;  %v795_v50 = vsel %vm791_vm5, %v790_v49, -inf }
 0x244   : > { %v792_v48 = vsel %vm791_vm5, %v789_v47, -inf }
 0x245   : > { %793 = vmax.xlane.f32.xlu0 %v792_v48 }
 0x249   : > { %796 = vmax.xlane.f32.xlu0 %v795_v50 }
 0x2d2   : > { %v794_v51 = vpop.xlane.xlu0 %793 }
 0x2d3   : > { %v798_v52 = vsub.f32 %v789_v47, %v794_v51 }
 0x2d5   : > { %v800_v53 = vmul.f32 1.442695, %v798_v52 }
 0x2d6   : > { %v797_v54 = vpop.xlane.xlu0 %796 }
 0x2d7   : > { %4943 = vpow2.f32 %v800_v53  ;;  %v799_v55 = vsub.f32 %v790_v49, %v797_v54 }
 0x2d9   : > { %v802_v56 = vmul.f32 1.442695, %v799_v55 }
 0x2db   : > { %4945 = vpow2.f32 %v802_v56 }
 0x2e1   : > { %v4944_v57 = vpop.eup %4943 }
 0x2e2   : > { %v804_v58 = vsel %vm791_vm5, %v4944_v57, 0.0 }
 0x2e3   : > { %805 = vadd.xlane.f32.xlu1 %v804_v58 }
 0x2e5   : > { %v4946_v59 = vpop.eup %4945 }
 0x2e6   : > { %v807_v60 = vsel %vm791_vm5, %v4946_v59, 0.0 }
 0x2e7   : > { %808 = vadd.xlane.f32.xlu1 %v807_v60 }
 0x370   : > { %v806_v13 = vpop.xlane.xlu1 %805 }
 0x371   : > { %4947 = vrcp.f32 %v806_v13 }
 0x374   : > { %v809_v14 = vpop.xlane.xlu1 %808 }
 0x375   : > { %4949 = vrcp.f32 %v809_v14  ;;  %v897_v14 = vld [vmem:[%s5448_s11] sm:$0xff] }
 0x37b   : > { %v4948_v16 = vpop.eup %4947 }
 0x37c   : > { %v812_v17 = vmul.f32 %v4948_v16, %v4944_v57  ;;  %v4249_v16 = vld [vmem:[%s5338_s21 + $0x40] sm:$0xff] }
 0x37e   : > { %4562 = vmatprep.mubr.msk.f32.mxu1 %vm791_vm5, %v812_v17  ;;  %v4250_v17 = vld [vmem:[%s5338_s21 + $0x48] sm:$0xff] }
 0x37f   : > { %v4950_v20 = vpop.eup %4949  ;;  %v4805_v18 = vpack.c.bf16 %v4250_v17, %v4249_v16 }
 0x380   : > { %v813_v21 = vmul.f32 %v4950_v20, %v4946_v59  ;;  %v4252_v20 = vld [vmem:[%s5338_s21 + $0x58] sm:$0xff] }
 0x382   : > { %4563 = vmatmul.mubr.msk.f32.vlgmr.msra.gmra.mrb[4].mxu1 %vm791_vm5, %v813_v21  ;;  %v4809_v21 = vpack.c.bf16 %v4252_v20, %v4251_v19  ;;  %v4291_v20 = vld [vmem:[%s5338_s21 + $0xe0] sm:$0xff] }
 0x383   : > { %4774 = vmatpush3.bf16.msra.mxu1 %v4771_v12  ;;  %4573 = vmatprep.mubr.msk.f32.mxu1 %vm437_vm1, %v5329_v2 }
 0x384   : > { %4776 = vmatprep.subr.bf16.mxu1 %v4775_v22 }
 0x387   : > { %4778 = vmatpush3.bf16.msra.mxu1 %v4775_v22  ;;  %v4257_v22 = vld [vmem:[%s5338_s21 + $0xc0] sm:$0xff] }
 0x388   : > { %4788 = vmatprep.subr.bf16.mxu1 %v4787_v41  ;;  %v4813_v27 = vpack.c.bf16 %v4258_v23, %v4257_v22  ;;  %v4283_v23 = vld [vmem:[%s5338_s21 + $0x60] sm:$0xff] }
 0x38a   : > { %4574 = vmatmul.mubr.msk.f32.vlgmr.msra.gmra.mrb[6].mxu1 %vm437_vm1, %v5348_v15 }
 0x38b   : > { %4595 = vmatprep.mubr.msk.f32.mxu1 %vm437_vm1, %v5329_v2  ;;  %4790 = vmatpush3.bf16.msra.mxu1 %v4787_v41 }
 0x38c   : > { %4792 = vmatprep.subr.bf16.mxu1 %v4791_v44 }
 0x38f   : > { %4794 = vmatpush3.bf16.msra.mxu1 %v4791_v44  ;;  %v4265_v44 = vld [vmem:[%s5338_s21 + $0x140] sm:$0xff] }
 0x392   : > { %4596 = vmatmul.mubr.msk.f32.vlgmr.msra.gmra.mrb[8].mxu1 %vm437_vm1, %v5348_v15 }
 0x455   : > { %v5425_v30 = vpop.f32.mrb[4].mxu1 }
 0x456   : > { %v5427_v31 = vpop.f32.mrb[5].mxu1 }
 0x45d   : > { %v4575_v33 = vpop.f32.mrb[6].mxu1 }
 0x45e   : > { %v979_v34 = vpop.f32.mrb[7].mxu1  ;;  %v985_v37 = vadd.f32 %v4575_v33, %v4218_v32  ;;  %v4254_v33 = vld [vmem:[%s5357_s23 + $0x2] ss:$0 sm:$0xff] }
 0x45f   : > { %v980_v36 = vadd.f32 %v4218_v32, %v979_v34  ;;  %v4817_v32 = vpack.c.bf16 %v4260_v29, %v4259_v28  ;;  %v4286_v28 = vld [vmem:[%s5338_s21 + $0x78] sm:$0xff] }
 0x461   : > { %4602 = vmatprep.mubr.msk.f32.mxu0 %vm699_vm2, %v980_v36 }
 0x462   : > { %4603 = vmatmul.mubr.msk.f32.vlgmr.msra.gmra.mrb[6].mxu0 %vm699_vm2, %v985_v37 }
 0x463   : > { %4613 = vmatpush3.msra.mxu0 %v4244_v7  ;;  %v4270_v7 = vld [vmem:[%s5357_s23 + $0xa] ss:$0 sm:$0xff] }
 0x464   : > { %4617 = vmatprep.subr.mxu0 %v897_v14 }
 0x465   : > { %v4597_v0 = vpop.f32.mrb[8].mxu1 }
 0x466   : > { %v1159_v3 = vpop.f32.mrb[9].mxu1  ;;  %v1165_v4 = vadd.f32 %v4597_v0, %v4234_v1 }
 0x467   : > { %v1160_v5 = vadd.f32 %v4234_v1, %v1159_v3 }
 0x469   : > { %v4801_v6 = vpack.c.bf16 %v1165_v4, %v1160_v5 }
 0x46b   : > { %4802 = vmatprep.subr.bf16.mxu1 %v4801_v6 }
 0x46c   : > { %4804 = vmatpush3.bf16.msra.mxu1 %v4801_v6 }
 0x46d   : > { %4806 = vmatprep.subr.bf16.mxu1 %v4805_v18 }
 0x535   : > { %v4604_v45 = vpop.f32.mrb[6].mxu0 }
 0x536   : > { %v1256_v47 = vmul.f32 0.35355338, %v4604_v45  ;;  %v1246_v48 = vpop.f32.mrb[7].mxu0  ;;  %v4266_v45 = vld [vmem:[%s5338_s21 + $0x148] sm:$0xff] }
 0x537   : > { %v1255_v49 = vmul.f32 0.35355338, %v1246_v48  ;;  %v4821_v48 = vpack.c.bf16 %v4266_v45, %v4265_v44 }
 0x538   : > { %v1258_v50 = vsel %vm5389_vm6, %v1256_v47, -1e+30  ;;  %v4267_v47 = vld [vmem:[%s5338_s21 + $0x150] sm:$0xff] }
 0x539   : > { %v1262_v51 = vsel %vm791_vm5, %v1258_v50, -inf  ;;  %v1257_v52 = vsel %vm5385_vm4, %v1255_v49, -1e+30  ;;  %v4268_v49 = vld [vmem:[%s5338_s21 + $0x158] sm:$0xff] }
 0x53a   : > { %1263 = vmax.xlane.f32.xlu1 %v1262_v51  ;;  %v1259_v53 = vsel %vm791_vm5, %v1257_v52, -inf }
 0x53b   : > { %1260 = vmax.xlane.f32.xlu0 %v1259_v53 }
 0x5c7   : > { %v1264_v54 = vpop.xlane.xlu1 %1263 }
 0x5c8   : > { %v1266_v55 = vsub.f32 %v1258_v50, %v1264_v54  ;;  %v1261_v56 = vpop.xlane.xlu0 %1260  ;;  %v4825_v50 = vpack.c.bf16 %v4268_v49, %v4267_v47  ;;  %v4299_v49 = vld [vmem:[%s5338_s21 + $0x160] sm:$0xff] }
 0x5c9   : > { %v1265_v57 = vsub.f32 %v1257_v52, %v1261_v56 }
 0x5ca   : > { %v1269_v58 = vmul.f32 1.442695, %v1266_v55 }
 0x5cb   : > { %v1267_v59 = vmul.f32 1.442695, %v1265_v57 }
 0x5cc   : > { %4951 = vpow2.f32 %v1269_v58 }
 0x5cd   : > { %4953 = vpow2.f32 %v1267_v59 }
 0x5d6   : > { %v4952_v60 = vpop.eup %4951 }
 0x5d7   : > { %v4954_v61 = vpop.eup %4953  ;;  %v1274_v62 = vsel %vm791_vm5, %v4952_v60, 0.0 }
 0x5d8   : > { %1275 = vadd.xlane.f32.xlu1 %v1274_v62  ;;  %v1271_v63 = vsel %vm791_vm5, %v4954_v61, 0.0 }
 0x5d9   : > { %1272 = vadd.xlane.f32.xlu0 %v1271_v63 }
 0x665   : > { %v1276_v8 = vpop.xlane.xlu1 %1275 }
 0x666   : > { %4955 = vrcp.f32 %v1276_v8  ;;  %v1273_v9 = vpop.xlane.xlu0 %1272 }
 0x667   : > { %4957 = vrcp.f32 %v1273_v9 }
 0x670   : > { %v4956_v10 = vpop.eup %4955 }
 0x671   : > { %v4958_v11 = vpop.eup %4957  ;;  %v1280_v13 = vmul.f32 %v4956_v10, %v4952_v60 }
 0x672   : > { %v1279_v12 = vmul.f32 %v4958_v11, %v4954_v61 }
 0x674   : > { %4609 = vmatprep.mubr.msk.f32.mxu1 %vm791_vm5, %v1279_v12  ;;  %v4280_v12 = vld [vmem:[%s5448_s11 + $0x10] sm:$0xff] }
 0x675   : > { %4610 = vmatmul.mubr.msk.f32.vlgmr.msra.gmra.mrb[10].mxu1 %vm791_vm5, %v1280_v13 }
 0x676   : > { %4630 = vmatprep.mubr.msk.f32.mxu1 %vm437_vm1, %v5329_v2  ;;  %4808 = vmatpush3.bf16.msra.mxu1 %v4805_v18 }
 0x677   : > { %4810 = vmatprep.subr.bf16.mxu1 %v4809_v21 }
 0x67a   : > { %4812 = vmatpush3.bf16.msra.mxu1 %v4809_v21  ;;  %v4292_v21 = vld [vmem:[%s5338_s21 + $0xe8] sm:$0xff] }
 0x67b   : > { %4822 = vmatprep.subr.bf16.mxu1 %v4821_v48  ;;  %v4847_v22 = vpack.c.bf16 %v4292_v21, %v4291_v20 }
 0x67d   : > { %4631 = vmatmul.mubr.msk.f32.vlgmr.msra.gmra.mrb[12].mxu1 %vm437_vm1, %v5348_v15 }
 0x67e   : > { %4652 = vmatprep.mubr.msk.f32.mxu1 %vm437_vm1, %v5329_v2  ;;  %4824 = vmatpush3.bf16.msra.mxu1 %v4821_v48 }
 0x67f   : > { %4826 = vmatprep.subr.bf16.mxu1 %v4825_v50 }
 0x682   : > { %4828 = vmatpush3.bf16.msra.mxu1 %v4825_v50  ;;  %v4300_v50 = vld [vmem:[%s5338_s21 + $0x168] sm:$0xff] }
 0x685   : > { %4653 = vmatmul.mubr.msk.f32.vlgmr.msra.gmra.mrb[14].mxu1 %vm437_vm1, %v5348_v15 }
 0x748   : > { %v4611_v25 = vpop.f32.mrb[10].mxu1 }
 0x749   : > { %v1353_v26 = vpop.f32.mrb[11].mxu1 }
 0x74a   : > { %4614 = vmatprep.mubr.msk.f32.mxu0 %vm699_vm2, %v1353_v26 }
 0x74b   : > { %4615 = vmatmul.mubr.msk.f32.vlgmr.msra.gmra.mrb[8].mxu0 %vm699_vm2, %v4611_v25  ;;  %v4284_v25 = vld [vmem:[%s5338_s21 + $0x68] sm:$0xff] }
 0x74c   : > { %4618 = vmatpush3.msra.mxu0 %v897_v14  ;;  %4619 = vmatprep.mubr.msk.f32.mxu0 %vm699_vm2, %v5427_v31  ;;  %v4839_v26 = vpack.c.bf16 %v4284_v25, %v4283_v23  ;;  %v5557_v23 = vsub.s32 0, %v5381_v35  ;;  %v5559_v25 = vld [vmem:[%s410_s13] sm:$0x3f] }
 0x74d   : > { %4814 = vmatprep.subr.bf16.mxu0 %v4813_v27 }
 0x750   : > { %v4632_v31 = vpop.f32.mrb[12].mxu1 }
 0x751   : > { %v1614_v34 = vadd.f32 %v4632_v31, %v4254_v33  ;;  %v1608_v36 = vpop.f32.mrb[13].mxu1 }
 0x752   : > { %v1609_v37 = vadd.f32 %v4254_v33, %v1608_v36  ;;  %v4294_v33 = vld [vmem:[%s5338_s21 + $0xf8] sm:$0xff] }
 0x753   : > { %4620 = vmatmul.mubr.msk.f32.vlgmr.msra.gmra.mrb[8].mxu0 %vm699_vm2, %v5425_v30  ;;  %v4262_v30 = vld [vmem:[%s5357_s23 + $0x6] ss:$0 sm:$0xff] }
 0x754   : > { %4816 = vmatpush3.bf16.msra.mxu0 %v4813_v27  ;;  %4641 = vmatprep.mubr.msk.f32.mxu0 %vm437_vm1, %v5329_v2  ;;  %v4285_v27 = vld [vmem:[%s5338_s21 + $0x70] sm:$0xff] }
 0x755   : > { %4818 = vmatprep.subr.bf16.mxu0 %v4817_v32  ;;  %v4843_v29 = vpack.c.bf16 %v4286_v28, %v4285_v27 }
 0x758   : > { %4820 = vmatpush3.bf16.msra.mxu0 %v4817_v32  ;;  %v4654_v6 = vpop.f32.mrb[14].mxu1  ;;  %v4293_v32 = vld [vmem:[%s5338_s21 + $0xf0] sm:$0xff] }
 0x759   : > { %v1788_v8 = vpop.f32.mrb[15].mxu1  ;;  %v1794_v9 = vadd.f32 %v4654_v6, %v4270_v7  ;;  %v4851_v36 = vpack.c.bf16 %v4294_v33, %v4293_v32 }
 0x75a   : > { %v1789_v10 = vadd.f32 %v4270_v7, %v1788_v8  ;;  %v4304_v8 = vld [vmem:[%s5357_s23 + $0xb] ss:$0 sm:$0xff] }
 0x75b   : > { %4642 = vmatmul.mubr.msk.f32.vlgmr.msra.gmra.mrb[10].mxu0 %vm437_vm1, %v5348_v15 }
 0x75c   : > { %4659 = vmatprep.mubr.msk.f32.mxu0 %vm699_vm2, %v1609_v37  ;;  %v4835_v11 = vpack.c.bf16 %v1794_v9, %v1789_v10  ;;  %v4288_v37 = vld [vmem:[%s5357_s23 + $0x3] ss:$0 sm:$0xff] }
 0x75e   : > { %4836 = vmatprep.subr.bf16.mxu1 %v4835_v11 }
 0x75f   : > { %4838 = vmatpush3.bf16.msra.mxu1 %v4835_v11 }
 0x760   : > { %4840 = vmatprep.subr.bf16.mxu1 %v4839_v26 }
 0x82e   : > { %v4643_v38 = vpop.f32.mrb[10].mxu0 }
 0x82f   : > { %v1704_v39 = vadd.f32 %v4643_v38, %v4262_v30  ;;  %v1698_v40 = vpop.f32.mrb[11].mxu0 }
 0x830   : > { %v1699_v41 = vadd.f32 %v4262_v30, %v1698_v40 }
 0x832   : > { %v4829_v42 = vpack.c.bf16 %v1704_v39, %v1699_v41  ;;  %v4296_v41 = vld [vmem:[%s5357_s23 + $0x7] ss:$0 sm:$0xff] }
 0x834   : > { %4831 = vmatprep.subr.msk.bf16.mxu0 %vm5363_vm3, %v4829_v42 }
 0x835   : > { %4834 = vmatpush3.bf16.xpose.msk.msra.mxu0 %vm5363_vm3, %v4829_v42 }
 0x836   : > { %4669 = vmatprep.subr.mxu0 %v4280_v12 }
 0x83c   : > { %4660 = vmatmul.mubr.msk.f32.vlgmr.msra.gmra.mrb[12].mxu0 %vm699_vm2, %v1614_v34 }
 0x83d   : > { %4670 = vmatpush3.msra.mxu0 %v4280_v12 }
 0x83e   : > { %4848 = vmatprep.subr.bf16.mxu0 %v4847_v22 }
 0x90f   : > { %v4661_v51 = vpop.f32.mrb[12].mxu0 }
 0x910   : > { %v1885_v52 = vmul.f32 0.35355338, %v4661_v51  ;;  %v1875_v53 = vpop.f32.mrb[13].mxu0  ;;  %v4301_v51 = vld [vmem:[%s5338_s21 + $0x170] sm:$0xff] }
 0x911   : > { %v1884_v54 = vmul.f32 0.35355338, %v1875_v53  ;;  %v4302_v53 = vld [vmem:[%s5338_s21 + $0x178] sm:$0xff] }
 0x912   : > { %v1887_v55 = vsel %vm5389_vm6, %v1885_v52, -1e+30  ;;  %v4855_v52 = vpack.c.bf16 %v4300_v50, %v4299_v49  ;;  %v2684_v50 = vld [vmem:[%s5319_s17 + $0x48] sm:$0xff] }
 0x913   : > { %v1891_v56 = vsel %vm791_vm5, %v1887_v55, -inf  ;;  %v1886_v57 = vsel %vm5385_vm4, %v1884_v54, -1e+30  ;;  %v4859_v54 = vpack.c.bf16 %v4302_v53, %v4301_v51 }
 0x914   : > { %1892 = vmax.xlane.f32.xlu1 %v1891_v56  ;;  %v1888_v58 = vsel %vm791_vm5, %v1886_v57, -inf }
 0x915   : > { %1889 = vmax.xlane.f32.xlu0 %v1888_v58 }
 0x9a1   : > { %v1893_v59 = vpop.xlane.xlu1 %1892 }
 0x9a2   : > { %v1895_v60 = vsub.f32 %v1887_v55, %v1893_v59  ;;  %v1890_v61 = vpop.xlane.xlu0 %1889 }
 0x9a3   : > { %v1894_v62 = vsub.f32 %v1886_v57, %v1890_v61 }
 0x9a4   : > { %v1898_v63 = vmul.f32 1.442695, %v1895_v60 }
 0x9a5   : > { %v1896_v0 = vmul.f32 1.442695, %v1894_v62 }
 0x9a6   : > { %4959 = vpow2.f32 %v1898_v63 }
 0x9a7   : > { %4961 = vpow2.f32 %v1896_v0 }
 0x9b0   : > { %v4960_v1 = vpop.eup %4959 }
 0x9b1   : > { %v4962_v3 = vpop.eup %4961  ;;  %v1903_v4 = vsel %vm791_vm5, %v4960_v1, 0.0 }
 0x9b2   : > { %1904 = vadd.xlane.f32.xlu1 %v1903_v4  ;;  %v1900_v5 = vsel %vm791_vm5, %v4962_v3, 0.0 }
 0x9b3   : > { %1901 = vadd.xlane.f32.xlu0 %v1900_v5 }
 0xa3f   : > { %v1905_v13 = vpop.xlane.xlu1 %1904 }
 0xa40   : > { %4963 = vrcp.f32 %v1905_v13  ;;  %v1902_v14 = vpop.xlane.xlu0 %1901  ;;  %v4314_v13 = vld [vmem:[%s5448_s11 + $0x18] sm:$0xff] }
 0xa41   : > { %4965 = vrcp.f32 %v1902_v14 }
 0xa4a   : > { %v4964_v16 = vpop.eup %4963 }
 0xa4b   : > { %v4966_v17 = vpop.eup %4965  ;;  %v1909_v19 = vmul.f32 %v4964_v16, %v4960_v1 }
 0xa4c   : > { %v1908_v18 = vmul.f32 %v4966_v17, %v4962_v3 }
 0xa4e   : > { %4666 = vmatprep.mubr.msk.f32.mxu1 %vm791_vm5, %v1908_v18 }
 0xa4f   : > { %4667 = vmatmul.mubr.msk.f32.vlgmr.msra.gmra.mrb[16].mxu1 %vm791_vm5, %v1909_v19 }
 0xa50   : > { %4682 = vmatprep.mubr.msk.f32.mxu1 %vm437_vm1, %v5329_v2  ;;  %4842 = vmatpush3.bf16.msra.mxu1 %v4839_v26  ;;  %v2630_v26 = vrot.slane %v5559_v25, %v5557_v23 }
 0xa51   : > { %4844 = vmatprep.subr.bf16.mxu1 %v4843_v29 }
 0xa54   : > { %4846 = vmatpush3.bf16.msra.mxu1 %v4843_v29 }
 0xa55   : > { %4856 = vmatprep.subr.bf16.mxu1 %v4855_v52 }
 0xa57   : > { %4683 = vmatmul.mubr.msk.f32.vlgmr.msra.gmra.mrb[18].mxu1 %vm437_vm1, %v5348_v15 }
 0xa58   : > { %4704 = vmatprep.mubr.msk.f32.mxu1 %vm437_vm1, %v5329_v2  ;;  %4858 = vmatpush3.bf16.msra.mxu1 %v4855_v52 }
 0xa59   : > { %4860 = vmatprep.subr.bf16.mxu1 %v4859_v54 }
 0xa5c   : > { %4862 = vmatpush3.bf16.msra.mxu1 %v4859_v54  ;;  %v2691_v54 = vld [vmem:[%s5319_s17 + $0x80] sm:$0xff] }
 0xa5f   : > { %4705 = vmatmul.mubr.msk.f32.vlgmr.msra.gmra.mrb[20].mxu1 %vm437_vm1, %v5348_v15 }
 0xb22   : > { %v4668_v31 = vpop.f32.mrb[16].mxu1 }
 0xb23   : > { %v1982_v34 = vpop.f32.mrb[17].mxu1 }
 0xb24   : > { %4671 = vmatprep.mubr.msk.f32.mxu0 %vm699_vm2, %v1982_v34 }
 0xb25   : > { %4672 = vmatmul.mubr.msk.f32.vlgmr.msra.gmra.mrb[8].mxu0 %vm699_vm2, %v4668_v31 }
 0xb26   : > { %4850 = vmatpush3.bf16.msra.mxu0 %v4847_v22  ;;  %4693 = vmatprep.mubr.msk.f32.mxu0 %vm437_vm1, %v5329_v2 }
 0xb27   : > { %4852 = vmatprep.subr.bf16.mxu0 %v4851_v36 }
 0xb2a   : > { %4854 = vmatpush3.bf16.msra.mxu0 %v4851_v36  ;;  %v4684_v30 = vpop.f32.mrb[18].mxu1 }
 0xb2b   : > { %v2164_v38 = vadd.f32 %v4684_v30, %v4288_v37  ;;  %v2158_v39 = vpop.f32.mrb[19].mxu1 }
 0xb2c   : > { %v2159_v40 = vadd.f32 %v4288_v37, %v2158_v39 }
 0xb2d   : > { %4694 = vmatmul.mubr.msk.f32.vlgmr.msra.gmra.mrb[14].mxu0 %vm437_vm1, %v5348_v15 }
 0xb2e   : > { %4711 = vmatprep.mubr.msk.f32.mxu0 %vm699_vm2, %v2159_v40 }
 0xb32   : > { %v4706_v7 = vpop.f32.mrb[20].mxu1 }
 0xb33   : > { %v2338_v9 = vpop.f32.mrb[21].mxu1  ;;  %v2344_v10 = vadd.f32 %v4706_v7, %v4304_v8 }
 0xb34   : > { %v2339_v11 = vadd.f32 %v4304_v8, %v2338_v9 }
 0xb36   : > { %v4869_v12 = vpack.c.bf16 %v2344_v10, %v2339_v11  ;;  %v5584_v11 = vsub.s32 1, %v5381_v35 }
 0xb38   : > { %4870 = vmatprep.subr.bf16.mxu1 %v4869_v12 }
 0xb39   : > { %4872 = vmatpush3.bf16.msra.mxu1 %v4869_v12  ;;  %v5587_v12 = vsub.s32 2, %v5381_v35 }
 0xc00   : > { %v4695_v42 = vpop.f32.mrb[14].mxu0 }
 0xc01   : > { %v2254_v44 = vadd.f32 %v4695_v42, %v4296_v41  ;;  %v2248_v45 = vpop.f32.mrb[15].mxu0 }
 0xc02   : > { %v2249_v47 = vadd.f32 %v4296_v41, %v2248_v45  ;;  %v2675_v45 = vld [vmem:[%s5319_s17] sm:$0xff] }
 0xc04   : > { %v4863_v48 = vpack.c.bf16 %v2254_v44, %v2249_v47  ;;  %v2683_v47 = vld [vmem:[%s5319_s17 + $0x40] sm:$0xff] }
 0xc05   : > { %v4319_v49 = vcombine.high %v2675_v45, %v2683_v47  ;;  %v4318_v51 = vcombine.low %v2675_v45, %v2683_v47  ;;  %v2704_v45 = vld [vmem:[%s5319_s17 + $0xe8] sm:$0xff] }
 0xc06   : > { %4865 = vmatprep.subr.msk.bf16.mxu0 %vm5363_vm3, %v4863_v48 }
 0xc07   : > { %4868 = vmatpush3.bf16.xpose.msk.msra.mxu0 %vm5363_vm3, %v4863_v48  ;;  %v2676_v48 = vld [vmem:[%s5319_s17 + $0x8] sm:$0xff]  ;;  %2956 = vmatprep.subr.bf16.mxu1 %v4319_v49 }
 0xc08   : > { %4721 = vmatprep.subr.mxu0 %v4314_v13  ;;  %v4320_v52 = vcombine.low %v2676_v48, %v2684_v50  ;;  %v4321_v53 = vcombine.high %v2676_v48, %v2684_v50 }
 0xc0e   : > { %4712 = vmatmul.mubr.msk.f32.vlgmr.msra.gmra.mrb[16].mxu0 %vm699_vm2, %v2164_v38 }
 0xc0f   : > { %4722 = vmatpush3.msra.mxu0 %v4314_v13  ;;  %v2665_v13 = vrot.slane %v5559_v25, %v5584_v11 }
 0xc10   : > { %2999 = vmatprep.subr.bf16.mxu0 %v4321_v53  ;;  %v2682_v53 = vld [vmem:[%s5319_s17 + $0x38] sm:$0xff] }
 0xce1   : > { %v4713_v55 = vpop.f32.mrb[16].mxu0 }
 0xce2   : > { %v2435_v56 = vmul.f32 0.35355338, %v4713_v55  ;;  %v2425_v57 = vpop.f32.mrb[17].mxu0  ;;  %v2699_v55 = vld [vmem:[%s5319_s17 + $0xc0] sm:$0xff] }
 0xce3   : > { %v2434_v24 = vmul.f32 0.35355338, %v2425_v57  ;;  %v4335_v57 = vcombine.high %v2691_v54, %v2699_v55 }
 0xce4   : > { %v2437_v58 = vsel %vm5389_vm6, %v2435_v56, -1e+30  ;;  %v2692_v56 = vld [vmem:[%s5319_s17 + $0x88] sm:$0xff] }
 0xce5   : > { %v2441_v59 = vsel %vm791_vm5, %v2437_v58, -inf  ;;  %v2436_v60 = vsel %vm5385_vm4, %v2434_v24, -1e+30  ;;  %v2700_v24 = vld [vmem:[%s5319_s17 + $0xc8] sm:$0xff] }
 0xce6   : > { %2442 = vmax.xlane.f32.xlu1 %v2441_v59  ;;  %v2438_v61 = vsel %vm791_vm5, %v2436_v60, -inf  ;;  %v4336_v59 = vcombine.low %v2692_v56, %v2700_v24 }
 0xce7   : > { %2439 = vmax.xlane.f32.xlu0 %v2438_v61  ;;  %v2677_v61 = vld [vmem:[%s5319_s17 + $0x10] sm:$0xff] }
 0xd73   : > { %v2443_v62 = vpop.xlane.xlu1 %2442 }
 0xd74   : > { %v2445_v63 = vsub.f32 %v2437_v58, %v2443_v62  ;;  %v2440_v0 = vpop.xlane.xlu0 %2439  ;;  %v4334_v58 = vcombine.low %v2691_v54, %v2699_v55  ;;  %v2685_v62 = vld [vmem:[%s5319_s17 + $0x50] sm:$0xff]  ;;  %v2690_v54 = vld [vmem:[%s5319_s17 + $0x78] sm:$0xff] }
 0xd75   : > { %v2444_v1 = vsub.f32 %v2436_v60, %v2440_v0  ;;  %v4337_v60 = vcombine.high %v2692_v56, %v2700_v24  ;;  %v4323_v0 = vcombine.high %v2677_v61, %v2685_v62  ;;  %v4333_v24 = vcombine.high %v2682_v53, %v2690_v54 }
 0xd76   : > { %v2448_v3 = vmul.f32 1.442695, %v2445_v63  ;;  %v2678_v63 = vld [vmem:[%s5319_s17 + $0x18] sm:$0xff] }
 0xd77   : > { %v2446_v4 = vmul.f32 1.442695, %v2444_v1  ;;  %v2686_v1 = vld [vmem:[%s5319_s17 + $0x58] sm:$0xff] }
 0xd78   : > { %4967 = vpow2.f32 %v2448_v3  ;;  %v5124_v3 = vmov 0  }
 0xd79   : > { %4969 = vpow2.f32 %v2446_v4  ;;  %v4322_v4 = vcombine.low %v2677_v61, %v2685_v62  ;;  %v2706_v61 = vld [vmem:[%s5319_s17 + $0xf8] sm:$0xff] }
 0xd82   : > { %v4968_v46 = vpop.eup %4967 }
 0xd83   : > { %v4970_v5 = vpop.eup %4969  ;;  %v2453_v6 = vsel %vm791_vm5, %v4968_v46, 0.0 }
 0xd84   : > { %2454 = vadd.xlane.f32.xlu1 %v2453_v6  ;;  %v2450_v43 = vsel %vm791_vm5, %v4970_v5, 0.0 }
 0xd85   : > { %2451 = vadd.xlane.f32.xlu0 %v2450_v43 }
 0xe11   : > { %v2455_v14 = vpop.xlane.xlu1 %2454 }
 0xe12   : > { %4971 = vrcp.f32 %v2455_v14  ;;  %v2452_v16 = vpop.xlane.xlu0 %2451 }
 0xe13   : > { %4973 = vrcp.f32 %v2452_v16 }
 0xe1c   : > { %v4972_v17 = vpop.eup %4971 }
 0xe1d   : > { %v4974_v18 = vpop.eup %4973  ;;  %v2459_v20 = vmul.f32 %v4972_v17, %v4968_v46  ;;  %v4324_v46 = vcombine.low %v2678_v63, %v2686_v1  ;;  %v2671_v17 = vrot.slane %v5559_v25, %v5587_v12 }
 0xe1e   : > { %v2458_v19 = vmul.f32 %v4974_v18, %v4970_v5  ;;  %v4325_v5 = vcombine.high %v2678_v63, %v2686_v1  ;;  %v4332_v63 = vcombine.low %v2682_v53, %v2690_v54 }
 0xe20   : > { %4718 = vmatprep.mubr.msk.f32.mxu1 %vm791_vm5, %v2458_v19 }
 0xe21   : > { %4719 = vmatmul.mubr.msk.f32.vlgmr.msra.gmra.mrb[22].mxu1 %vm791_vm5, %v2459_v20 }
 0xe22   : > { %2957 = vmatpush1.bf16.msra.mxu1 %v4318_v51  ;;  %2988 = vmatprep.mubr.bf16.mxu1 %v5124_v3  ;;  %v2681_v51 = vld [vmem:[%s5319_s17 + $0x30] sm:$0xff] }
 0xe23   : > { %2958 = vmatprep.subr.bf16.mxu1 %v4335_v57 }
 0xe26   : > { %2959 = vmatpush1.bf16.msra.mxu1 %v4334_v58  ;;  %v2697_v58 = vld [vmem:[%s5319_s17 + $0xb0] sm:$0xff] }
 0xe27   : > { %3042 = vmatprep.subr.bf16.mxu1 %v4323_v0 }
 0xef4   : > { %v4720_v21 = vpop.f32.mrb[22].mxu1 }
 0xef5   : > { %v2532_v22 = vpop.f32.mrb[23].mxu1 }
 0xef6   : > { %4723 = vmatprep.mubr.msk.f32.mxu0 %vm699_vm2, %v2532_v22  ;;  %v2693_v22 = vld [vmem:[%s5319_s17 + $0x90] sm:$0xff] }
 0xef7   : > { %4724 = vmatmul.mubr.msk.f32.vlgmr.msra.gmra.mrb[8].mxu0 %vm699_vm2, %v4720_v21 }
 0xef8   : > { %3000 = vmatpush1.bf16.msra.mxu0 %v4320_v52  ;;  %3031 = vmatprep.mubr.bf16.mxu0 %v5124_v3  ;;  %v2689_v52 = vld [vmem:[%s5319_s17 + $0x70] sm:$0xff] }
 0xef9   : > { %3001 = vmatprep.subr.bf16.mxu0 %v4337_v60  ;;  %v4331_v57 = vcombine.high %v2681_v51, %v2689_v52  ;;  %v2698_v60 = vld [vmem:[%s5319_s17 + $0xb8] sm:$0xff]  ;;  %v4330_v62 = vcombine.low %v2681_v51, %v2689_v52 }
 0xefa   : > { %v4349_v1 = vcombine.high %v2698_v60, %v2706_v61 }
 0xefc   : > { %3002 = vmatpush1.bf16.msra.mxu0 %v4336_v59  ;;  %v2705_v59 = vld [vmem:[%s5319_s17 + $0xf0] sm:$0xff] }
 0xefd   : > { %3085 = vmatprep.subr.bf16.mxu0 %v4325_v5  ;;  %v4347_v0 = vcombine.high %v2697_v58, %v2705_v59  ;;  %v3349_v5 = vld [vmem:[%s5324_s10 + $0x8] sm:$0xff] }
 0xfca   : > { %v4725_v27 = vpop.f32.mrb[8].mxu0 }
 0xfcb   : > { %v2632_v28 = vadd.f32 %v4725_v27, %v2630_v26  ;;  %v2616_v29 = vpop.f32.mrb[9].mxu0  ;;  %v2701_v27 = vld [vmem:[%s5319_s17 + $0xd0] sm:$0xff] }
 0xfcc   : > { %v2631_v32 = vadd.f32 %v2630_v26, %v2616_v29  ;;  %v2702_v29 = vld [vmem:[%s5319_s17 + $0xd8] sm:$0xff] }
 0xfcd   : > { %v2634_v33 = vadd.f32 %v2632_v28, %v5348_v15  ;;  %v2694_v28 = vld [vmem:[%s5319_s17 + $0x98] sm:$0xff] }
 0xfce   : > { %v2633_v31 = vadd.f32 %v2631_v32, %v5329_v2 }
 0xfcf   : > { %v2638_v34 = vsel %vm437_vm1, %v2634_v33, 0.0 }
 0xfd0   : > { %2639 = vadd.xlane.f32.xlu1 %v2638_v34  ;;  %v2635_v36 = vsel %vm437_vm1, %v2633_v31, 0.0  ;;  %v4341_v34 = vcombine.high %v2694_v28, %v2702_v29 }
 0xfd1   : > { %2636 = vadd.xlane.f32.xlu0 %v2635_v36  ;;  %v2679_v36 = vld [vmem:[%s5319_s17 + $0x20] sm:$0xff] }
0x105d   : > { %v2640_v37 = vpop.xlane.xlu1 %2639 }
0x105e   : > { %v2643_v30 = vmul.f32 0.03125, %v2640_v37  ;;  %v2637_v38 = vpop.xlane.xlu0 %2636  ;;  %v2687_v37 = vld [vmem:[%s5319_s17 + $0x60] sm:$0xff] }
0x105f   : > { %v2642_v39 = vmul.f32 0.03125, %v2637_v38  ;;  %v2688_v38 = vld [vmem:[%s5319_s17 + $0x68] sm:$0xff]  ;;  %v4326_v47 = vcombine.low %v2679_v36, %v2687_v37 }
0x1060   : > { %v2645_v40 = vsub.f32 %v2634_v33, %v2643_v30  ;;  %v2680_v30 = vld [vmem:[%s5319_s17 + $0x28] sm:$0xff] }
0x1061   : > { %v2644_v41 = vsub.f32 %v2633_v31, %v2642_v39  ;;  %v4339_v31 = vcombine.high %v2693_v22, %v2701_v27  ;;  %v4338_v39 = vcombine.low %v2693_v22, %v2701_v27  ;;  %v4328_v48 = vcombine.low %v2680_v30, %v2688_v38  ;;  %v5652_v22 = vld [vmem:[%s5324_s10 + $0x10] sm:$0xff] }
0x1062   : > { %v2647_v42 = vmul.f32 %v2645_v40, %v2645_v40  ;;  %v5655_v27 = vld [vmem:[%s5324_s10 + $0x50] sm:$0xff] }
0x1063   : > { %v2646_v15 = vmul.f32 %v2644_v41, %v2644_v41 }
0x1064   : > { %v2651_v2 = vsel %vm437_vm1, %v2647_v42, 0.0  ;;  %v4329_v42 = vcombine.high %v2680_v30, %v2688_v38  ;;  %v5676_v30 = vsub.s32 3, %v5381_v35 }
0x1065   : > { %2652 = vadd.xlane.f32.xlu1 %v2651_v2  ;;  %v2648_v44 = vsel %vm437_vm1, %v2646_v15, 0.0  ;;  %v2695_v15 = vld [vmem:[%s5319_s17 + $0xa0] sm:$0xff] }
0x1066   : > { %2649 = vadd.xlane.f32.xlu0 %v2648_v44  ;;  %v2703_v2 = vld [vmem:[%s5319_s17 + $0xe0] sm:$0xff]  ;;  %v2696_v44 = vld [vmem:[%s5319_s17 + $0xa8] sm:$0xff] }
0x1067   : > { %v4343_v49 = vcombine.high %v2695_v15, %v2703_v2  ;;  %v4345_v50 = vcombine.high %v2696_v44, %v2704_v45  ;;  %v4342_v55 = vcombine.low %v2695_v15, %v2703_v2  ;;  %v4344_v56 = vcombine.low %v2696_v44, %v2704_v45 }
0x1068   : > { %v2739_v15 = vsub.s32 6, %v5381_v35  ;;  %v5687_v45 = vsub.s32 5, %v5381_v35 }
0x10f2   : > { %v2653_v6 = vpop.xlane.xlu1 %2652 }
0x10f3   : > { %v2655_v43 = vmul.f32 0.03125, %v2653_v6  ;;  %v2650_v7 = vpop.xlane.xlu0 %2649  ;;  %v3357_v6 = vld [vmem:[%s5324_s10 + $0x48] sm:$0xff] }
0x10f4   : > { %v2654_v8 = vmul.f32 0.03125, %v2650_v7  ;;  %v4348_v7 = vcombine.low %v2698_v60, %v2706_v61 }
0x10f5   : > { %v2657_v9 = vadd.f32 1e-05, %v2655_v43  ;;  %v4346_v43 = vcombine.low %v2697_v58, %v2705_v59 }
0x10f6   : > { %v2656_v10 = vadd.f32 1e-05, %v2654_v8 }
0x10f7   : > { %4975 = vrsqrt.f32 %v2657_v9  ;;  %v4361_v9 = vcombine.high %v3349_v5, %v3357_v6 }
0x10f8   : > { %4977 = vrsqrt.f32 %v2656_v10 }
0x1101   : > { %v4976_v14 = vpop.eup %4975 }
0x1102   : > { %v4978_v16 = vpop.eup %4977  ;;  %v2661_v18 = vmul.f32 %v4976_v14, %v2645_v40  ;;  %v4340_v40 = vcombine.low %v2694_v28, %v2702_v29  ;;  %v3364_v14 = vld [vmem:[%s5324_s10 + $0x80] sm:$0xff]  ;;  %v5658_v28 = vld [vmem:[%s5324_s10 + $0x18] sm:$0xff]  ;;  %v4363_v29 = vcombine.high %v5652_v22, %v5655_v27 }
0x1103   : > { %v2660_v19 = vmul.f32 %v4978_v16, %v2644_v41  ;;  %v4327_v41 = vcombine.high %v2679_v36, %v2687_v37  ;;  %v3365_v16 = vld [vmem:[%s5324_s10 + $0x88] sm:$0xff]  ;;  %v2709_v37 = vld [vmem:[%s5672_s24] sm:$0xff] }
0x1104   : > { %v2667_v20 = vmul.f32 %v2665_v13, %v2661_v18  ;;  %v3373_v18 = vld [vmem:[%s5324_s10 + $0xc8] sm:$0xff]  ;;  %v2716_v38 = vrot.slane %v2709_v37, %v5557_v23  ;;  %v2740_v60 = vrot.slane %v2709_v37, %v2739_v15 }
0x1105   : > { %v2666_v21 = vmul.f32 %v2665_v13, %v2660_v19  ;;  %v4360_v13 = vcombine.low %v3349_v5, %v3357_v6 }
0x1106   : > { %v5594_v26 = vadd.f32 %v2671_v17, %v2667_v20  ;;  %v4376_v20 = vcombine.low %v3365_v16, %v3373_v18 }
0x1107   : > { %v5599_v32 = vadd.f32 %v2671_v17, %v2666_v21  ;;  %v4377_v21 = vcombine.high %v3365_v16, %v3373_v18 }
0x1109   : > { %v5603_v33 = vpack.c.bf16 %v5594_v26, %v5599_v32 }
0x110b   : > { %4350 = vmatmul.mubr.msk.bf16.vlgmr.msra.gmra.mrb[24].mxu1 %vm437_vm1, %v5603_v33  ;;  %4351 = vmatmul.mubr.msk.bf16.vlgmr.msra.gmra.mrb[20].mxu0 %vm437_vm1, %v5603_v33 }
0x110c   : > { %3043 = vmatpush1.bf16.msra.mxu1 %v4322_v4  ;;  %3086 = vmatpush1.bf16.msra.mxu0 %v4324_v46  ;;  %v3348_v4 = vld [vmem:[%s5324_s10] sm:$0xff] }
0x110d   : > { %3044 = vmatprep.subr.bf16.mxu1 %v4339_v31  ;;  %3087 = vmatprep.subr.bf16.mxu0 %v4341_v34  ;;  %v3356_v46 = vld [vmem:[%s5324_s10 + $0x40] sm:$0xff]  ;;  %v4362_v31 = vcombine.low %v5652_v22, %v5655_v27 }
0x110e   : > { %3074 = vmatprep.mubr.bf16.mxu1 %v5124_v3  ;;  %3117 = vmatprep.mubr.bf16.mxu0 %v5124_v3  ;;  %v4359_v8 = vcombine.high %v3348_v4, %v3356_v46  ;;  %v4358_v10 = vcombine.low %v3348_v4, %v3356_v46 }
0x1110   : > { %3045 = vmatpush1.bf16.msra.mxu1 %v4338_v39  ;;  %3088 = vmatpush1.bf16.msra.mxu0 %v4340_v40  ;;  %v2724_v39 = vrot.slane %v2709_v37, %v5587_v12  ;;  %v2720_v40 = vrot.slane %v2709_v37, %v5584_v11 }
0x1111   : > { %3128 = vmatprep.subr.bf16.mxu1 %v4327_v41  ;;  %3171 = vmatprep.subr.bf16.mxu0 %v4329_v42  ;;  %v2728_v41 = vrot.slane %v2709_v37, %v5676_v30  ;;  %v5683_v42 = vsub.s32 4, %v5381_v35 }
0x1113   : > { %4352 = vmatmul.mubr.msk.bf16.vlgmr.msra.gmra.mrb[28].mxu1 %vm437_vm1, %v5603_v33  ;;  %4353 = vmatmul.mubr.msk.bf16.vlgmr.msra.gmra.mrb[24].mxu0 %vm437_vm1, %v5603_v33  ;;  %v2732_v59 = vrot.slane %v2709_v37, %v5683_v42 }
0x1114   : > { %3129 = vmatpush1.bf16.msra.mxu1 %v4326_v47  ;;  %3172 = vmatpush1.bf16.msra.mxu0 %v4328_v48  ;;  %v2743_v47 = vsub.s32 7, %v5381_v35  ;;  %v3376_v35 = vld [vmem:[%s5324_s10 + $0xe0] sm:$0xff] }
0x1115   : > { %3130 = vmatprep.subr.bf16.mxu1 %v4343_v49  ;;  %3173 = vmatprep.subr.bf16.mxu0 %v4345_v50 }
0x1116   : > { %3160 = vmatprep.mubr.bf16.mxu1 %v5124_v3  ;;  %3203 = vmatprep.mubr.bf16.mxu0 %v5124_v3 }
0x1118   : > { %3131 = vmatpush1.bf16.msra.mxu1 %v4342_v55  ;;  %3174 = vmatpush1.bf16.msra.mxu0 %v4344_v56 }
0x1119   : > { %3214 = vmatprep.subr.bf16.mxu1 %v4331_v57  ;;  %3257 = vmatprep.subr.bf16.mxu0 %v4333_v24 }
0x111b   : > { %4354 = vmatmul.mubr.msk.bf16.vlgmr.msra.gmra.mrb[32].mxu1 %vm437_vm1, %v5603_v33  ;;  %4355 = vmatmul.mubr.msk.bf16.vlgmr.msra.gmra.mrb[28].mxu0 %vm437_vm1, %v5603_v33 }
0x111c   : > { %3215 = vmatpush1.bf16.msra.mxu1 %v4330_v62  ;;  %3258 = vmatpush1.bf16.msra.mxu0 %v4332_v63  ;;  %v2736_v63 = vrot.slane %v2709_v37, %v5687_v45 }
0x111d   : > { %3216 = vmatprep.subr.bf16.mxu1 %v4347_v0  ;;  %3259 = vmatprep.subr.bf16.mxu0 %v4349_v1  ;;  %v2744_v0 = vrot.slane %v2709_v37, %v2743_v47  ;;  %v5697_v1 = vld [vmem:[%s5672_s24 + $0x8] sm:$0xff] }
0x111e   : > { %3246 = vmatprep.mubr.bf16.mxu1 %v5124_v3  ;;  %3289 = vmatprep.mubr.bf16.mxu0 %v5124_v3  ;;  %v3372_v3 = vld [vmem:[%s5324_s10 + $0xc0] sm:$0xff] }
0x111f   : > { %v4375_v17 = vcombine.high %v3364_v14, %v3372_v3  ;;  %v4374_v19 = vcombine.low %v3364_v14, %v3372_v3  ;;  %v5706_v14 = vld [vmem:[%s5324_s10 + $0x98] sm:$0xff] }
0x1120   : > { %3217 = vmatpush1.bf16.msra.mxu1 %v4346_v43  ;;  %3260 = vmatpush1.bf16.msra.mxu0 %v4348_v7  ;;  %v5700_v43 = vld [vmem:[%s5324_s10 + $0x90] sm:$0xff]  ;;  %v5709_v3 = vld [vmem:[%s5324_s10 + $0xd8] sm:$0xff] }
0x1121   : > { %3544 = vmatprep.subr.bf16.mxu1 %v4359_v8  ;;  %3585 = vmatprep.subr.bf16.mxu0 %v4361_v9  ;;  %v5703_v7 = vld [vmem:[%s5324_s10 + $0xd0] sm:$0xff] }
0x1123   : > { %4356 = vmatmul.mubr.msk.bf16.vlgmr.msra.gmra.mrb[36].mxu1 %vm437_vm1, %v5603_v33  ;;  %4357 = vmatmul.mubr.msk.bf16.vlgmr.msra.gmra.mrb[32].mxu0 %vm437_vm1, %v5603_v33  ;;  %v5663_v33 = vld [vmem:[%s5324_s10 + $0x58] sm:$0xff] }
0x1124   : > { %v4364_v34 = vcombine.low %v5658_v28, %v5663_v33  ;;  %v4365_v36 = vcombine.high %v5658_v28, %v5663_v33  ;;  %v5736_v28 = vld [vmem:[%s5324_s10 + $0x28] sm:$0xff] }
0x1125   : > { %v5739_v33 = vld [vmem:[%s5324_s10 + $0x68] sm:$0xff] }
0x1129   : > { %3545 = vmatpush1.bf16.xpose.msra.mxu1 %v4358_v10  ;;  %3586 = vmatpush1.bf16.xpose.msra.mxu0 %v4360_v13 }
0x112a   : > { %3546 = vmatprep.subr.bf16.mxu1 %v4375_v17  ;;  %3587 = vmatprep.subr.bf16.mxu0 %v4377_v21 }
0x1131   : > { %3547 = vmatpush1.bf16.xpose.msra.mxu1 %v4374_v19  ;;  %3588 = vmatpush1.bf16.xpose.msra.mxu0 %v4376_v20 }
0x1132   : > { %3626 = vmatprep.subr.bf16.mxu1 %v4363_v29  ;;  %3667 = vmatprep.subr.bf16.mxu0 %v4365_v36  ;;  %v2748_v29 = vrot.slane %v5697_v1, %v5557_v23 }
0x11de   : > { %v2990_v2 = vpop.f32.mrb[24].mxu1  ;;  %v3033_v44 = vpop.f32.mrb[20].mxu0 }
0x11df   : > { %v2991_v48 = vadd.f32 %v2990_v2, %v2716_v38  ;;  %v3034_v49 = vadd.f32 %v3033_v44, %v2724_v39  ;;  %v2992_v50 = vpop.f32.mrb[25].mxu1  ;;  %v3035_v51 = vpop.f32.mrb[21].mxu0 }
0x11e0   : > { %v2993_v52 = vadd.f32 %v2992_v50, %v2720_v40  ;;  %v3036_v53 = vadd.f32 %v3035_v51, %v2728_v41  ;;  %v2994_v54 = vpop.f32.mrb[26].mxu1  ;;  %v3037_v55 = vpop.f32.mrb[22].mxu0  ;;  %v2756_v50 = vrot.slane %v5697_v1, %v5587_v12  ;;  %v2760_v12 = vrot.slane %v5697_v1, %v5676_v30 }
0x11e1   : > { %v2995_v56 = vadd.f32 %v2994_v54, %v2716_v38  ;;  %v3038_v57 = vadd.f32 %v3037_v55, %v2724_v39  ;;  %v2996_v24 = vpop.f32.mrb[27].mxu1  ;;  %v3039_v58 = vpop.f32.mrb[23].mxu0  ;;  %v3300_v4 = vmax.f32 %v2991_v48, 0.0  ;;  %v3302_v46 = vmax.f32 %v3034_v49, 0.0 }
0x11e2   : > { %v2997_v61 = vadd.f32 %v2996_v24, %v2720_v40  ;;  %v3040_v62 = vadd.f32 %v3039_v58, %v2728_v41  ;;  %v3301_v8 = vmax.f32 %v2993_v52, 0.0  ;;  %v3303_v9 = vmax.f32 %v3036_v53, 0.0 }
0x11e3   : > { %v3316_v5 = vmax.f32 %v2995_v56, 0.0  ;;  %v3318_v6 = vmax.f32 %v3038_v57, 0.0  ;;  %v4379_v40 = vcombine.high %v5700_v43, %v5703_v7  ;;  %v4381_v41 = vcombine.high %v5706_v14, %v5709_v3 }
0x11e4   : > { %v3317_v10 = vmax.f32 %v2997_v61, 0.0  ;;  %v3319_v13 = vmax.f32 %v3040_v62, 0.0  ;;  %v2752_v54 = vrot.slane %v5697_v1, %v5584_v11  ;;  %v5730_v11 = vld [vmem:[%s5324_s10 + $0x20] sm:$0xff] }
0x11e5   : > { %v3332_v16 = vpack.c.bf16 %v3316_v5, %v3300_v4  ;;  %v3334_v17 = vpack.c.bf16 %v3318_v6, %v3302_v46  ;;  %v4378_v5 = vcombine.low %v5700_v43, %v5703_v7  ;;  %v4380_v6 = vcombine.low %v5706_v14, %v5709_v3 }
0x11e6   : > { %v3333_v18 = vpack.c.bf16 %v3317_v10, %v3301_v8  ;;  %v3335_v19 = vpack.c.bf16 %v3319_v13, %v3303_v9  ;;  %v3076_v20 = vpop.f32.mrb[28].mxu1  ;;  %v3119_v21 = vpop.f32.mrb[24].mxu0  ;;  %v2764_v43 = vrot.slane %v5697_v1, %v5683_v42 }
0x11e7   : > { %v3077_v36 = vadd.f32 %v3076_v20, %v2732_v59  ;;  %v3120_v37 = vadd.f32 %v3119_v21, %v2740_v60  ;;  %v3078_v38 = vpop.f32.mrb[29].mxu1  ;;  %v3121_v39 = vpop.f32.mrb[25].mxu0 }
0x11e8   : > { %v3079_v2 = vadd.f32 %v3078_v38, %v2736_v63  ;;  %v3122_v44 = vadd.f32 %v3121_v39, %v2744_v0  ;;  %v3080_v48 = vpop.f32.mrb[30].mxu1  ;;  %v3123_v49 = vpop.f32.mrb[26].mxu0  ;;  %3576 = vmatprep.mubr.bf16.mxu1 %v3333_v18  ;;  %3617 = vmatprep.mubr.bf16.mxu0 %v3335_v19  ;;  %v2768_v38 = vrot.slane %v5697_v1, %v5687_v45 }
0x11e9   : > { %v3081_v23 = vadd.f32 %v3080_v48, %v2732_v59  ;;  %v3124_v51 = vadd.f32 %v3123_v49, %v2740_v60  ;;  %v3082_v52 = vpop.f32.mrb[31].mxu1  ;;  %v3125_v53 = vpop.f32.mrb[27].mxu0  ;;  %3577 = vmatmul.mubr.bf16.vlgmr.msra.gmra.mrb[40].mxu1 %v3332_v16  ;;  %3618 = vmatmul.mubr.bf16.vlgmr.msra.gmra.mrb[36].mxu0 %v3334_v17  ;;  %v3304_v57 = vmax.f32 %v3077_v36, 0.0  ;;  %v3306_v24 = vmax.f32 %v3120_v37, 0.0  ;;  %v5733_v60 = vld [vmem:[%s5324_s10 + $0x60] sm:$0xff] }
0x11ea   : > { %v3083_v55 = vadd.f32 %v3082_v52, %v2736_v63  ;;  %v3126_v56 = vadd.f32 %v3125_v53, %v2744_v0  ;;  %3627 = vmatpush1.bf16.xpose.msra.mxu1 %v4362_v31  ;;  %3668 = vmatpush1.bf16.xpose.msra.mxu0 %v4364_v34  ;;  %v3305_v22 = vmax.f32 %v3079_v2, 0.0  ;;  %v3307_v27 = vmax.f32 %v3122_v44, 0.0 }
0x11eb   : > { %v3320_v58 = vmax.f32 %v3081_v23, 0.0  ;;  %v3322_v59 = vmax.f32 %v3124_v51, 0.0  ;;  %3628 = vmatprep.subr.bf16.mxu1 %v4379_v40  ;;  %3669 = vmatprep.subr.bf16.mxu0 %v4381_v41  ;;  %v4367_v16 = vcombine.high %v5730_v11, %v5733_v60  ;;  %v4369_v17 = vcombine.high %v5736_v28, %v5739_v33  ;;  %v3368_v51 = vld [vmem:[%s5324_s10 + $0xa0] sm:$0xff] }
0x11ec   : > { %v3321_v31 = vmax.f32 %v3083_v55, 0.0  ;;  %v3323_v61 = vmax.f32 %v3126_v56, 0.0  ;;  %v2772_v37 = vrot.slane %v5697_v1, %v2739_v15  ;;  %v3377_v55 = vld [vmem:[%s5324_s10 + $0xe8] sm:$0xff] }
0x11ed   : > { %v5741_v34 = vpack.c.bf16 %v3320_v58, %v3304_v57  ;;  %v5743_v62 = vpack.c.bf16 %v3322_v59, %v3306_v24  ;;  %v4366_v57 = vcombine.low %v5730_v11, %v5733_v60 }
0x11ee   : > { %v3337_v63 = vpack.c.bf16 %v3321_v31, %v3305_v22  ;;  %v3339_v0 = vpack.c.bf16 %v3323_v61, %v3307_v27  ;;  %v3162_v4 = vpop.f32.mrb[32].mxu1  ;;  %v3205_v46 = vpop.f32.mrb[28].mxu0  ;;  %v4368_v27 = vcombine.low %v5736_v28, %v5739_v33 }
0x11ef   : > { %v3163_v8 = vadd.f32 %v3162_v4, %v2748_v29  ;;  %v3206_v9 = vadd.f32 %v3205_v46, %v2756_v50  ;;  %v3164_v10 = vpop.f32.mrb[33].mxu1  ;;  %v3207_v13 = vpop.f32.mrb[29].mxu0  ;;  %v4383_v4 = vcombine.high %v3368_v51, %v3376_v35 }
0x11f0   : > { %v3165_v18 = vadd.f32 %v3164_v10, %v2752_v54  ;;  %v3208_v19 = vadd.f32 %v3207_v13, %v2760_v12  ;;  %v3166_v20 = vpop.f32.mrb[34].mxu1  ;;  %v3209_v21 = vpop.f32.mrb[30].mxu0  ;;  %3658 = vmatprep.mubr.bf16.mxu1 %v3337_v63  ;;  %3699 = vmatprep.mubr.bf16.mxu0 %v3339_v0 }
0x11f1   : > { %v3167_v7 = vadd.f32 %v3166_v20, %v2748_v29  ;;  %v3210_v14 = vadd.f32 %v3209_v21, %v2756_v50  ;;  %v3168_v3 = vpop.f32.mrb[35].mxu1  ;;  %v3211_v36 = vpop.f32.mrb[31].mxu0  ;;  %v2776_v29 = vrot.slane %v5697_v1, %v2743_v47  ;;  %v3308_v41 = vmax.f32 %v3163_v8, 0.0 }
0x11f2   : > { %v3169_v39 = vadd.f32 %v3168_v3, %v2752_v54  ;;  %v3212_v40 = vadd.f32 %v3211_v36, %v2760_v12  ;;  %3629 = vmatpush1.bf16.xpose.msra.mxu1 %v4378_v5  ;;  %3670 = vmatpush1.bf16.xpose.msra.mxu0 %v4380_v6  ;;  %v3310_v2 = vmax.f32 %v3206_v9, 0.0  ;;  %v3309_v15 = vmax.f32 %v3165_v18, 0.0  ;;  %v3369_v54 = vld [vmem:[%s5324_s10 + $0xa8] sm:$0xff]  ;;  %v3354_v18 = vld [vmem:[%s5324_s10 + $0x30] sm:$0xff] }
0x11f3   : > { %v3324_v44 = vmax.f32 %v3167_v7, 0.0  ;;  %v3326_v48 = vmax.f32 %v3210_v14, 0.0  ;;  %3708 = vmatprep.subr.bf16.mxu1 %v4367_v16  ;;  %3749 = vmatprep.subr.bf16.mxu0 %v4369_v17  ;;  %v3311_v49 = vmax.f32 %v3208_v19, 0.0  ;;  %v4385_v46 = vcombine.high %v3369_v54, %v3377_v55  ;;  %v3362_v19 = vld [vmem:[%s5324_s10 + $0x70] sm:$0xff]  ;;  %v3363_v7 = vld [vmem:[%s5324_s10 + $0x78] sm:$0xff] }
0x11f4   : > { %v3325_v50 = vmax.f32 %v3169_v39, 0.0  ;;  %v3327_v23 = vmax.f32 %v3212_v40, 0.0  ;;  %v4382_v36 = vcombine.low %v3368_v51, %v3376_v35  ;;  %v3370_v40 = vld [vmem:[%s5324_s10 + $0xb0] sm:$0xff]  ;;  %v3383_v51 = vrot.slane %v5559_v25, %v5676_v30 }
0x11f5   : > { %v5764_v52 = vpack.c.bf16 %v3324_v44, %v3308_v41  ;;  %v5766_v53 = vpack.c.bf16 %v3326_v48, %v3310_v2  ;;  %v4370_v41 = vcombine.low %v3354_v18, %v3362_v19  ;;  %v3371_v2 = vld [vmem:[%s5324_s10 + $0xb8] sm:$0xff] }
0x11f6   : > { %v3341_v47 = vpack.c.bf16 %v3325_v50, %v3309_v15  ;;  %v3343_v1 = vpack.c.bf16 %v3327_v23, %v3311_v49  ;;  %v3248_v56 = vpop.f32.mrb[36].mxu1  ;;  %v3291_v12 = vpop.f32.mrb[32].mxu0  ;;  %v3379_v44 = vld [vmem:[%s5324_s10 + $0xf8] sm:$0xff] }
0x11f7   : > { %v3249_v24 = vadd.f32 %v3248_v56, %v2764_v43  ;;  %v3292_v58 = vadd.f32 %v3291_v12, %v2772_v37  ;;  %v3250_v59 = vpop.f32.mrb[37].mxu1  ;;  %v3293_v22 = vpop.f32.mrb[33].mxu0  ;;  %v4389_v49 = vcombine.high %v3371_v2, %v3379_v44  ;;  %v4388_v23 = vcombine.low %v3371_v2, %v3379_v44 }
0x11f8   : > { %v3251_v31 = vadd.f32 %v3250_v59, %v2768_v38  ;;  %v3294_v61 = vadd.f32 %v3293_v22, %v2776_v29  ;;  %v3252_v63 = vpop.f32.mrb[38].mxu1  ;;  %v3295_v0 = vpop.f32.mrb[34].mxu0 }
0x11f9   : > { %v3253_v5 = vadd.f32 %v3252_v63, %v2764_v43  ;;  %v3296_v6 = vadd.f32 %v3295_v0, %v2772_v37  ;;  %3659 = vmatmul.mubr.bf16.vlgmr.msra.gmra.mrb[44].mxu1 %v5741_v34  ;;  %3700 = vmatmul.mubr.bf16.vlgmr.msra.gmra.mrb[40].mxu0 %v5743_v62  ;;  %v3254_v11 = vpop.f32.mrb[39].mxu1  ;;  %v3297_v60 = vpop.f32.mrb[35].mxu0  ;;  %v3312_v28 = vmax.f32 %v3249_v24, 0.0  ;;  %v3314_v33 = vmax.f32 %v3292_v58, 0.0  ;;  %v3355_v43 = vld [vmem:[%s5324_s10 + $0x38] sm:$0xff] }
0x11fa   : > { %v3255_v8 = vadd.f32 %v3254_v11, %v2768_v38  ;;  %v3298_v9 = vadd.f32 %v3297_v60, %v2776_v29  ;;  %3709 = vmatpush1.bf16.xpose.msra.mxu1 %v4366_v57  ;;  %3740 = vmatprep.mubr.bf16.mxu1 %v3341_v47  ;;  %v3313_v16 = vmax.f32 %v3251_v31, 0.0  ;;  %v3315_v34 = vmax.f32 %v3294_v61, 0.0  ;;  %v3378_v29 = vld [vmem:[%s5324_s10 + $0xf0] sm:$0xff] }
0x11fb   : > { %v3328_v10 = vmax.f32 %v3253_v5, 0.0  ;;  %v3330_v13 = vmax.f32 %v3296_v6, 0.0  ;;  %3750 = vmatpush1.bf16.xpose.msra.mxu0 %v4368_v27  ;;  %3781 = vmatprep.mubr.bf16.mxu0 %v3343_v1  ;;  %v4384_v37 = vcombine.low %v3369_v54, %v3377_v55  ;;  %v4371_v38 = vcombine.high %v3354_v18, %v3362_v19 }
0x11fc   : > { %v3329_v17 = vmax.f32 %v3255_v8, 0.0  ;;  %v3331_v62 = vmax.f32 %v3298_v9, 0.0  ;;  %3710 = vmatprep.subr.bf16.mxu1 %v4383_v4  ;;  %3751 = vmatprep.subr.bf16.mxu0 %v4385_v46  ;;  %v4373_v39 = vcombine.high %v3355_v43, %v3363_v7  ;;  %v4372_v48 = vcombine.low %v3355_v43, %v3363_v7 }
0x11fd   : > { %v3344_v20 = vpack.c.bf16 %v3328_v10, %v3312_v28  ;;  %v3346_v21 = vpack.c.bf16 %v3330_v13, %v3314_v33  ;;  %v4387_v15 = vcombine.high %v3370_v40, %v3378_v29  ;;  %v4386_v50 = vcombine.low %v3370_v40, %v3378_v29 }
0x11fe   : > { %v3345_v14 = vpack.c.bf16 %v3329_v17, %v3313_v16  ;;  %v3347_v3 = vpack.c.bf16 %v3331_v62, %v3315_v34 }
0x1202   : > { %3711 = vmatpush1.bf16.xpose.msra.mxu1 %v4382_v36 }
0x1203   : > { %3752 = vmatpush1.bf16.xpose.msra.mxu0 %v4384_v37  ;;  %3790 = vmatprep.subr.bf16.mxu1 %v4371_v38 }
0x1204   : > { %3831 = vmatprep.subr.bf16.mxu0 %v4373_v39 }
0x1209   : > { %3741 = vmatmul.mubr.bf16.vlgmr.msra.gmra.mrb[48].mxu1 %v5764_v52 }
0x120a   : > { %3782 = vmatmul.mubr.bf16.vlgmr.msra.gmra.mrb[44].mxu0 %v5766_v53  ;;  %3791 = vmatpush1.bf16.xpose.msra.mxu1 %v4370_v41 }
0x120b   : > { %3822 = vmatprep.mubr.bf16.mxu1 %v3345_v14  ;;  %3832 = vmatpush1.bf16.xpose.msra.mxu0 %v4372_v48 }
0x120c   : > { %3863 = vmatprep.mubr.bf16.mxu0 %v3347_v3  ;;  %3792 = vmatprep.subr.bf16.mxu1 %v4387_v15 }
0x120d   : > { %3833 = vmatprep.subr.bf16.mxu0 %v4389_v49 }
0x1212   : > { %3793 = vmatpush1.bf16.xpose.msra.mxu1 %v4386_v50 }
0x1213   : > { %3834 = vmatpush1.bf16.xpose.msra.mxu0 %v4388_v23 }
0x1219   : > { %3823 = vmatmul.mubr.bf16.vlgmr.msra.gmra.mrb[52].mxu1 %v3344_v20 }
0x121a   : > { %3864 = vmatmul.mubr.bf16.vlgmr.msra.gmra.mrb[48].mxu0 %v3346_v21 }
0x12bc   : > { %v3578_v35 = vpop.f32.mrb[40].mxu1  ;;  %v3619_v52 = vpop.f32.mrb[36].mxu0 }
0x12bd   : > { %v3579_v54 = vadd.f32 %v3578_v35, %v3383_v51  ;;  %v3580_v55 = vpop.f32.mrb[41].mxu1  ;;  %v3621_v53 = vpop.f32.mrb[37].mxu0 }
0x12be   : > { %v3581_v47 = vpop.f32.mrb[42].mxu1  ;;  %v3622_v1 = vpop.f32.mrb[38].mxu0 }
0x12bf   : > { %v3620_v56 = vadd.f32 %v3619_v52, %v3579_v54  ;;  %v3582_v12 = vadd.f32 %v3581_v47, %v3383_v51  ;;  %v3583_v57 = vpop.f32.mrb[43].mxu1  ;;  %v3624_v24 = vpop.f32.mrb[39].mxu0 }
0x12c0   : > { %v3909_v57 = vrot.slane %v5559_v25, %v5687_v45  ;;  %v3920_v45 = vld [vmem:[%s5830_s6 + $0x10] sm:$0xff] (!%p4390_p5) }
0x12c1   : > { %v3623_v58 = vadd.f32 %v3622_v1, %v3582_v12 }
0x12cc   : > { %v3660_v59 = vpop.f32.mrb[44].mxu1  ;;  %v3701_v22 = vpop.f32.mrb[40].mxu0 }
0x12cd   : > { %v3661_v27 = vadd.f32 %v3660_v59, %v3620_v56  ;;  %v3662_v31 = vpop.f32.mrb[45].mxu1  ;;  %v3703_v61 = vpop.f32.mrb[41].mxu0  ;;  %v3903_v56 = vrot.slane %v5559_v25, %v5683_v42  ;;  %v3918_v42 = vld [vmem:[%s5830_s6] sm:$0xff] (!%p4390_p5)  ;;  %v3919_v25 = vld [vmem:[%s5830_s6 + $0x8] sm:$0xff] (!%p4390_p5) }
0x12ce   : > { %v3663_v63 = vpop.f32.mrb[46].mxu1  ;;  %v3704_v0 = vpop.f32.mrb[42].mxu0 }
0x12cf   : > { %v3702_v30 = vadd.f32 %v3701_v22, %v3661_v27  ;;  %v3664_v4 = vadd.f32 %v3663_v63, %v3623_v58  ;;  %v3665_v46 = vpop.f32.mrb[47].mxu1  ;;  %v3706_v5 = vpop.f32.mrb[43].mxu0  ;;  %v5125_v63 = vmov (!%p4390_p5), 0.0|0.0  }
0x12d0   : > { %4873 = vmatprep.subr.bf16.mxu0 (!%p4390_p5), %v5125_v63 }
0x12d1   : > { %v3705_v6 = vadd.f32 %v3704_v0, %v3664_v4  ;;  %v4874_v0 = vpack.c.bf16 (!%p4390_p5), %v3919_v25, %v3918_v42  ;;  %v5127_v4 = vmov (!%p4390_p5), 0.0  }
0x12d2   : > { %4734 = vmatprep.mubr.msk.f32.mxu0 (!%p4390_p5), %vm5126_vm7, %v5127_v4 }
0x12d3   : > { %4875 = vmatpush3.bf16.msra.mxu0 (!%p4390_p5), %v4874_v0 }
0x12d4   : > { %4876 = vmatprep.subr.bf16.mxu0 (!%p4390_p5), %v5125_v63 }
0x12dc   : > { %v3742_v11 = vpop.f32.mrb[48].mxu1 }
0x12dd   : > { %v3743_v60 = vadd.f32 %v3742_v11, %v3702_v30  ;;  %v3783_v8 = vpop.f32.mrb[44].mxu0  ;;  %v3744_v9 = vpop.f32.mrb[49].mxu1  ;;  %v3921_v30 = vld [vmem:[%s5830_s6 + $0x18] sm:$0xff] (!%p4390_p5) }
0x12de   : > { %v3785_v28 = vpop.f32.mrb[45].mxu0  ;;  %v3745_v33 = vpop.f32.mrb[50].mxu1  ;;  %v4877_v46 = vpack.c.bf16 (!%p4390_p5), %v3921_v30, %v3920_v45 }
0x12df   : > { %v3784_v10 = vadd.f32 %v3783_v8, %v3743_v60  ;;  %v3746_v13 = vadd.f32 %v3745_v33, %v3705_v6  ;;  %v3786_v16 = vpop.f32.mrb[46].mxu0  ;;  %v3747_v34 = vpop.f32.mrb[51].mxu1  ;;  %v4391_v6 = vld [vmem:[%s5830_s6 + $0x20] ss:$0 sm:$0xff] (!%p4390_p5) }
0x12e0   : > { %v3788_v17 = vpop.f32.mrb[47].mxu0  ;;  %4878 = vmatpush3.bf16.msra.mxu0 (!%p4390_p5), %v4877_v46 }
0x12e1   : > { %v3787_v62 = vadd.f32 %v3786_v16, %v3746_v13 }
0x12ec   : > { %v3824_v18 = vpop.f32.mrb[52].mxu1 }
0x12ed   : > { %v3825_v19 = vadd.f32 %v3824_v18, %v3784_v10  ;;  %v3865_v20 = vpop.f32.mrb[48].mxu0  ;;  %v3826_v21 = vpop.f32.mrb[53].mxu1 }
0x12ee   : > { %v3867_v43 = vpop.f32.mrb[49].mxu0  ;;  %v3827_v7 = vpop.f32.mrb[54].mxu1 }
0x12ef   : > { %v3866_v14 = vadd.f32 %v3865_v20, %v3825_v19  ;;  %v3828_v3 = vadd.f32 %v3827_v7, %v3787_v62  ;;  %v3868_v36 = vpop.f32.mrb[50].mxu0  ;;  %v3829_v37 = vpop.f32.mrb[55].mxu1 }
0x12f0   : > { %v3870_v38 = vpop.f32.mrb[51].mxu0 }
0x12f1   : > { %v3869_v39 = vadd.f32 %v3868_v36, %v3828_v3  ;;  %v3872_v40 = vadd.f32 %v3866_v14, %v5599_v32 }
0x12f3   : > { %v3874_v29 = vsel %vm437_vm1, %v3872_v40, 0.0  ;;  %v3873_v41 = vadd.f32 %v3869_v39, %v5594_v26 }
0x12f4   : > { %3875 = vadd.xlane.f32.xlu0 %v3874_v29 }
0x12f5   : > { %v3877_v2 = vsel %vm437_vm1, %v3873_v41, 0.0 }
0x12f6   : > { %3878 = vadd.xlane.f32.xlu1 %v3877_v2 }
0x1381   : > { %v3876_v44 = vpop.xlane.xlu0 %3875 }
0x1382   : > { %v3880_v48 = vmul.f32 0.03125, %v3876_v44 }
0x1383   : > { %v3879_v15 = vpop.xlane.xlu1 %3878 }
0x1384   : > { %v3882_v49 = vsub.f32 %v3872_v40, %v3880_v48  ;;  %v3881_v50 = vmul.f32 0.03125, %v3879_v15 }
0x1386   : > { %v3883_v23 = vsub.f32 %v3873_v41, %v3881_v50  ;;  %v3884_v51 = vmul.f32 %v3882_v49, %v3882_v49 }
0x1388   : > { %v3886_v35 = vsel %vm437_vm1, %v3884_v51, 0.0  ;;  %v3885_v52 = vmul.f32 %v3883_v23, %v3883_v23 }
0x1389   : > { %3887 = vadd.xlane.f32.xlu0 %v3886_v35 }
0x138a   : > { %v3889_v32 = vsel %vm437_vm1, %v3885_v52, 0.0 }
0x138b   : > { %3890 = vadd.xlane.f32.xlu1 %v3889_v32 }
0x1416   : > { %v3888_v54 = vpop.xlane.xlu0 %3887 }
0x1417   : > { %v3892_v26 = vmul.f32 0.03125, %v3888_v54 }
0x1418   : > { %v3891_v55 = vpop.xlane.xlu1 %3890 }
0x1419   : > { %v3894_v53 = vadd.f32 1e-05, %v3892_v26  ;;  %v3893_v47 = vmul.f32 0.03125, %v3891_v55 }
0x141b   : > { %4979 = vrsqrt.f32 %v3894_v53  ;;  %v3895_v1 = vadd.f32 1e-05, %v3893_v47 }
0x141d   : > { %4981 = vrsqrt.f32 %v3895_v1 }
0x1425   : > { %v4980_v12 = vpop.eup %4979 }
0x1426   : > { %v3898_v24 = vmul.f32 %v4980_v12, %v3882_v49 }
0x1427   : > { %v4982_v58 = vpop.eup %4981 }
0x1428   : > { %v3904_v59 = vmul.f32 %v3903_v56, %v3898_v24  ;;  %v3899_v22 = vmul.f32 %v4982_v58, %v3883_v23  ;;  %3917 = sbr.rel (%p4390_p5) target bundleno = 5383 (0x1507), region = 80 }
0x142a   : > { %v3910_v27 = vadd.f32 %v3909_v57, %v3904_v59  ;;  %v3905_v31 = vmul.f32 %v3903_v56, %v3899_v22 }
0x142c   : > { %3912 = vst.msk [vmem:[#allocation2] sm:$0xff] %vm437_vm1, %v3910_v27  ;;  %v3911_v61 = vadd.f32 %v3909_v57, %v3905_v31 }
0x142e   : > { %3913 = vst.msk [vmem:[#allocation2 + $0x8] sm:$0xff] %vm437_vm1, %v3911_v61  ;;  %v3928_v5 = vrot.slane (!%p4390_p5), %v3911_v61, 6 }
0x1430   : > { %4735 = vmatmul.mubr.msk.f32.vlgmr.msra.gmra.mrb[0].mxu0 %vm437_vm1, %v3928_v5 }
0x1503   : > { %v3997_v11 = vpop.f32.mrb[0].mxu0 }
0x1504   : > { %v3998_v60 = vadd.f32 %v4391_v6, %v3997_v11  ;;  %v4736_v8 = vpop.f32.mrb[1].mxu0 }
0x1506   : > { %4002 = vst.msk [vmem:[%s5833_s9] sm:$0x3] %vm4001_vm8, %v3998_v60 }
0x1507 PF: > { %s22_s30 = sadd.s32 1, %s5113_s30  }
0x1508   : > { %p19_p7 = scmp.ge.s32.totalorder %s22_s30, 4  }
0x150a   :  { %21 = sbr.rel (!%p19_p7) target bundleno = 3 (0x3), region = 140 }
0x1511   :  { %4014 = vsyncpa [#allocation4], 1 }
0x1512   :  { %4016 = vsyncpa [#allocation4 + $0x1], 1 }
0x1513   :  { %4017 = vsyncpa [#allocation6], 1 }
0x1514   :  { %4018 = vsyncpa [#allocation9], 1 }

</bundles_post_ra>
